<compile_context>
chip_gen: v6e
topology: v6e:2x2x1
jax: 0.10.0
libtpu: 0.0.40
codegen_flags: <defaults>
</compile_context>

<pallas_src>
import jax
import jax.numpy as jnp
from jax import lax
from jax.experimental import pallas as pl
from jax.experimental.pallas import tpu as pltpu


K = 9              # conv kernel size
P = (K - 1) // 2   # padding = 4


def basic_block_kernel(xpad_ref, w1_ref, t1_ref, w2_ref, t2_ref, wid_ref,
                       out_ref, hpad_ref):
    """One batch sample per grid step (batch dim squeezed away).

    xpad_ref : (L+2P, Cin)   zero-padded input, channels last, bf16
    w1_ref   : (K, Cin, Cp)  conv1 taps, BN1 scale folded in, bf16
    t1_ref   : (1, Cp)       folded shift: b1*s1 + (beta1 - m1*s1), f32
    w2_ref   : (K, Cp, Cp)   conv2 taps, BN2 scale folded in, bf16
    t2_ref   : (1, Cp)       folded shift: b2*s2 + (beta2 - m2*s2) + bid, f32
    wid_ref  : (Cin, Cp)     1x1 identity-conv weight, bf16
    out_ref  : (L, Cp)       f32 output (Cp = Cout padded to 128 lanes)
    hpad_ref : (L+2P, Cp)    VMEM scratch for the padded intermediate, bf16
    """
    L, Cp = out_ref.shape

    # ---- conv1 (+ folded bn1) and identity: K accumulating matmuls --------
    acc1 = jnp.zeros((L, Cp), jnp.float32)
    ident = None
    for k in range(K):                              # static unroll, K = 9
        xk = xpad_ref[pl.ds(k, L), :]               # (L, Cin) bf16, from ref
        acc1 = acc1 + jnp.dot(xk, w1_ref[k],
                              preferred_element_type=jnp.float32)
        if k == P:                                  # reuse the centred tap
            ident = jnp.dot(xk, wid_ref[...],
                            preferred_element_type=jnp.float32)
    h = jnp.maximum(acc1 + t1_ref[...], 0.0)        # (L, Cp) f32

    # ---- stage padded intermediate in VMEM (no register-level concat) -----
    hpad_ref[...] = jnp.zeros_like(hpad_ref)
    hpad_ref[pl.ds(P, L), :] = h.astype(hpad_ref.dtype)

    # ---- conv2 (+ folded bn2) + identity + relu ----------------------------
    acc2 = ident + t2_ref[...]                      # (L, Cp) f32
    for k in range(K):
        hk = hpad_ref[pl.ds(k, L), :]               # (L, Cp) bf16, from ref
        acc2 = acc2 + jnp.dot(hk, w2_ref[k],
                              preferred_element_type=jnp.float32)

    out_ref[...] = jnp.maximum(acc2, 0.0).astype(out_ref.dtype)


def basic_block_pallas(x_ncl, params):
    """x_ncl: (N, Cin, L) float32, PyTorch layout.  Returns (N, Cout, L)."""
    N, Cin, L = x_ncl.shape
    Cout = params["w1"].shape[0]
    Cp = ((Cout + 127) // 128) * 128      # lane-dense padded channel dim
    Lp = L + 2 * P

    # ---- glue: channels-last, spatial zero-pad, bf16 MXU operand ----------
    x_nlc = jnp.transpose(x_ncl, (0, 2, 1))                      # (N, L, Cin)
    xpad = jnp.pad(x_nlc, ((0, 0), (P, P), (0, 0))).astype(jnp.bfloat16)

    # ---- fold BatchNorm (eval mode) into weights / per-channel shifts -----
    def fold_bn(gamma, beta, mean, var, eps=1e-5):
        scale = gamma / jnp.sqrt(var + eps)
        return scale, beta - mean * scale

    s1, t1 = fold_bn(params["g1"], params["be1"], params["m1"], params["v1"])
    s2, t2 = fold_bn(params["g2"], params["be2"], params["m2"], params["v2"])

    def pad_last(a, width):
        return jnp.pad(a, [(0, 0)] * (a.ndim - 1) + [(0, width - a.shape[-1])])

    # conv weights (Cout, Cin, K) -> (K, Cin, Cout), BN scale folded into
    # output columns, channel dims zero-padded to Cp, cast to bf16.
    w1 = pad_last(jnp.transpose(params["w1"], (2, 1, 0)) * s1[None, None, :],
                  Cp).astype(jnp.bfloat16)                       # (K, Cin, Cp)
    w2_core = jnp.transpose(params["w2"], (2, 1, 0)) * s2[None, None, :]
    w2 = jnp.pad(w2_core,
                 ((0, 0), (0, Cp - Cout), (0, Cp - Cout))
                 ).astype(jnp.bfloat16)                          # (K, Cp, Cp)
    wid = pad_last(jnp.transpose(params["wid"][:, :, 0], (1, 0)),
                   Cp).astype(jnp.bfloat16)                      # (Cin, Cp)

    # conv biases (and identity-conv bias) folded into per-channel shifts
    shift1 = pad_last((params["b1"] * s1 + t1).reshape(1, Cout), Cp)  # (1,Cp)
    shift2 = pad_last((params["b2"] * s2 + t2 + params["bid"]
                       ).reshape(1, Cout), Cp)                        # (1,Cp)

    full = lambda shape: pl.BlockSpec(shape, lambda n: (0,) * len(shape))

    out_pad = pl.pallas_call(
        basic_block_kernel,
        out_shape=jax.ShapeDtypeStruct((N, L, Cp), jnp.float32),
        grid_spec=pltpu.PrefetchScalarGridSpec(
            num_scalar_prefetch=0,
            grid=(N,),                                    # one sample / step
            in_specs=[
                pl.BlockSpec((pl.Squeezed(), Lp, Cin), lambda n: (n, 0, 0)),
                full((K, Cin, Cp)),                       # w1
                full((1, Cp)),                            # shift1
                full((K, Cp, Cp)),                        # w2
                full((1, Cp)),                            # shift2
                full((Cin, Cp)),                          # wid
            ],
            out_specs=pl.BlockSpec((pl.Squeezed(), L, Cp),
                                   lambda n: (n, 0, 0)),
            scratch_shapes=[pltpu.VMEM((Lp, Cp), jnp.bfloat16)],
        ),
        compiler_params=pltpu.CompilerParams(
            dimension_semantics=("parallel",),   # >= 2 steps: both v7x TCs
            vmem_limit_bytes=32 * 1024 * 1024),
    )(xpad, w1, shift1, w2, shift2, wid)

    out_nlc = out_pad[:, :, :Cout]               # drop lane padding
    return jnp.transpose(out_nlc, (0, 2, 1))     # back to (N, Cout, L)


# ------------------------- pure-JAX reference -------------------------------
def conv1d_ref(x_ncl, w_oik, b):
    y = lax.conv_general_dilated(
        x_ncl, w_oik, window_strides=(1,),
        padding=[((w_oik.shape[2] - 1) // 2,) * 2],
        dimension_numbers=("NCH", "OIH", "NCH"))
    return y + b[None, :, None]


def bn_ref(y, gamma, beta, mean, var, eps=1e-5):
    return ((y - mean[None, :, None]) / jnp.sqrt(var[None, :, None] + eps)
            * gamma[None, :, None] + beta[None, :, None])


def basic_block_ref(x_ncl, p):
    out = conv1d_ref(x_ncl, p["w1"], p["b1"])
    out = jnp.maximum(bn_ref(out, p["g1"], p["be1"], p["m1"], p["v1"]), 0.0)
    out = conv1d_ref(out, p["w2"], p["b2"])
    out = bn_ref(out, p["g2"], p["be2"], p["m2"], p["v2"])
    identity = conv1d_ref(x_ncl, p["wid"], p["bid"])
    return jnp.maximum(out + identity, 0.0)


# ---------------------------------------------------------------------------
if __name__ == "__main__":
    N, Cin, Cout, L = 2, 4, 8, 16   # change_no_channels=True (Cin != Cout)

    key = jax.random.PRNGKey(0)
    ks = jax.random.split(key, 8)

    params = {
        "w1": 0.1 * jax.random.normal(ks[0], (Cout, Cin, K), jnp.float32),
        "b1": 0.1 * jax.random.normal(ks[1], (Cout,), jnp.float32),
        "w2": 0.1 * jax.random.normal(ks[2], (Cout, Cout, K), jnp.float32),
        "b2": 0.1 * jax.random.normal(ks[3], (Cout,), jnp.float32),
        "wid": 0.1 * jax.random.normal(ks[4], (Cout, Cin, 1), jnp.float32),
        "bid": 0.1 * jax.random.normal(ks[5], (Cout,), jnp.float32),
        # BatchNorm1d (eval mode): deterministic non-trivial stats/affine
        "g1": 1.0 + 0.1 * jnp.arange(Cout, dtype=jnp.float32),
        "be1": 0.05 * jnp.arange(Cout, dtype=jnp.float32),
        "m1": 0.02 * jnp.arange(Cout, dtype=jnp.float32),
        "v1": 1.0 + 0.05 * jnp.arange(Cout, dtype=jnp.float32),
        "g2": 1.0 - 0.03 * jnp.arange(Cout, dtype=jnp.float32),
        "be2": -0.02 * jnp.arange(Cout, dtype=jnp.float32),
        "m2": 0.01 * jnp.arange(Cout, dtype=jnp.float32),
        "v2": 1.0 + 0.02 * jnp.arange(Cout, dtype=jnp.float32),
    }

    x = jax.random.normal(ks[6], (N, Cin, L), jnp.float32)   # PyTorch NCL

    out = jax.block_until_ready(basic_block_pallas(x, params))
    ref = jax.block_until_ready(basic_block_ref(x, params))

    assert out.shape == (N, Cout, L)
    # bf16 MXU operands (f32 accumulate) -> relaxed tolerance per review.
    err = jnp.max(jnp.abs(out - ref))
    assert jnp.allclose(out, ref, rtol=3e-2, atol=3e-2), f"max abs err {err}"

    print("KERNEL_OK")
</pallas_src>

<mosaic_0001>
module attributes {stable_mosaic.version = 11 : i64} {
  func.func @basic_block_kernel(%arg0: i32, %arg1: memref<1x24x4xbf16, #tpu.memory_space<vmem>>, %arg2: memref<9x4x128xbf16, #tpu.memory_space<vmem>>, %arg3: memref<1x128xf32, #tpu.memory_space<vmem>>, %arg4: memref<9x128x128xbf16, #tpu.memory_space<vmem>>, %arg5: memref<1x128xf32, #tpu.memory_space<vmem>>, %arg6: memref<4x128xbf16, #tpu.memory_space<vmem>>, %arg7: memref<1x16x128xf32, #tpu.memory_space<vmem>>, %arg8: memref<24x128xbf16, #tpu.memory_space<vmem>>) attributes {dimension_semantics = [#tpu.dimension_semantics<parallel>], iteration_bounds = array<i64: 2>, scalar_prefetch = 0 : i64, scratch_operands = 1 : i64, tpu.core_type = #tpu.core_type<tc>, window_params = [{transform_indices = @transform_0, window_bounds = array<i64: 1, 24, 4>}, {pipeline_mode = #tpu.pipeline_mode<synchronous>, transform_indices = @transform_1, window_bounds = array<i64: 9, 4, 128>}, {pipeline_mode = #tpu.pipeline_mode<synchronous>, transform_indices = @transform_2, window_bounds = array<i64: 1, 128>}, {pipeline_mode = #tpu.pipeline_mode<synchronous>, transform_indices = @transform_3, window_bounds = array<i64: 9, 128, 128>}, {pipeline_mode = #tpu.pipeline_mode<synchronous>, transform_indices = @transform_4, window_bounds = array<i64: 1, 128>}, {pipeline_mode = #tpu.pipeline_mode<synchronous>, transform_indices = @transform_5, window_bounds = array<i64: 4, 128>}, {transform_indices = @transform_6, window_bounds = array<i64: 1, 16, 128>}]} {
    %cst = arith.constant 0.000000e+00 : f32
    %0 = vector.broadcast %cst : f32 to vector<16x128xf32>
    %c0 = arith.constant 0 : index
    %c0_0 = arith.constant 0 : index
    %c0_1 = arith.constant 0 : index
    %1 = vector.load %arg1[%c0, %c0_0, %c0_1] : memref<1x24x4xbf16, #tpu.memory_space<vmem>>, vector<1x16x4xbf16>
    %2 = vector.shape_cast %1 : vector<1x16x4xbf16> to vector<16x4xbf16>
    %c0_2 = arith.constant 0 : index
    %c0_3 = arith.constant 0 : index
    %c0_4 = arith.constant 0 : index
    %3 = vector.load %arg2[%c0_2, %c0_3, %c0_4] : memref<9x4x128xbf16, #tpu.memory_space<vmem>>, vector<1x4x128xbf16>
    %4 = vector.shape_cast %3 : vector<1x4x128xbf16> to vector<4x128xbf16>
    %cst_5 = arith.constant dense<0.000000e+00> : vector<16x128xf32>
    %5 = tpu.matmul %2, %4, %cst_5 {dimension_numbers = #tpu.dot_dimension_numbers<[1], [0], [0], [1], [0, 0, 1, 1], [], []>} : vector<16x4xbf16>, vector<4x128xbf16>, vector<16x128xf32> -> vector<16x128xf32>
    %6 = arith.addf %0, %5 : vector<16x128xf32>
    %c0_6 = arith.constant 0 : index
    %c1 = arith.constant 1 : index
    %c0_7 = arith.constant 0 : index
    %7 = vector.load %arg1[%c0_6, %c1, %c0_7] : memref<1x24x4xbf16, #tpu.memory_space<vmem>>, vector<1x16x4xbf16>
    %8 = vector.shape_cast %7 : vector<1x16x4xbf16> to vector<16x4xbf16>
    %c1_8 = arith.constant 1 : index
    %c0_9 = arith.constant 0 : index
    %c0_10 = arith.constant 0 : index
    %9 = vector.load %arg2[%c1_8, %c0_9, %c0_10] : memref<9x4x128xbf16, #tpu.memory_space<vmem>>, vector<1x4x128xbf16>
    %10 = vector.shape_cast %9 : vector<1x4x128xbf16> to vector<4x128xbf16>
    %cst_11 = arith.constant dense<0.000000e+00> : vector<16x128xf32>
    %11 = tpu.matmul %8, %10, %cst_11 {dimension_numbers = #tpu.dot_dimension_numbers<[1], [0], [0], [1], [0, 0, 1, 1], [], []>} : vector<16x4xbf16>, vector<4x128xbf16>, vector<16x128xf32> -> vector<16x128xf32>
    %12 = arith.addf %6, %11 : vector<16x128xf32>
    %c0_12 = arith.constant 0 : index
    %c2 = arith.constant 2 : index
    %c0_13 = arith.constant 0 : index
    %13 = vector.load %arg1[%c0_12, %c2, %c0_13] : memref<1x24x4xbf16, #tpu.memory_space<vmem>>, vector<1x16x4xbf16>
    %14 = vector.shape_cast %13 : vector<1x16x4xbf16> to vector<16x4xbf16>
    %c2_14 = arith.constant 2 : index
    %c0_15 = arith.constant 0 : index
    %c0_16 = arith.constant 0 : index
    %15 = vector.load %arg2[%c2_14, %c0_15, %c0_16] : memref<9x4x128xbf16, #tpu.memory_space<vmem>>, vector<1x4x128xbf16>
    %16 = vector.shape_cast %15 : vector<1x4x128xbf16> to vector<4x128xbf16>
    %cst_17 = arith.constant dense<0.000000e+00> : vector<16x128xf32>
    %17 = tpu.matmul %14, %16, %cst_17 {dimension_numbers = #tpu.dot_dimension_numbers<[1], [0], [0], [1], [0, 0, 1, 1], [], []>} : vector<16x4xbf16>, vector<4x128xbf16>, vector<16x128xf32> -> vector<16x128xf32>
    %18 = arith.addf %12, %17 : vector<16x128xf32>
    %c0_18 = arith.constant 0 : index
    %c3 = arith.constant 3 : index
    %c0_19 = arith.constant 0 : index
    %19 = vector.load %arg1[%c0_18, %c3, %c0_19] : memref<1x24x4xbf16, #tpu.memory_space<vmem>>, vector<1x16x4xbf16>
    %20 = vector.shape_cast %19 : vector<1x16x4xbf16> to vector<16x4xbf16>
    %c3_20 = arith.constant 3 : index
    %c0_21 = arith.constant 0 : index
    %c0_22 = arith.constant 0 : index
    %21 = vector.load %arg2[%c3_20, %c0_21, %c0_22] : memref<9x4x128xbf16, #tpu.memory_space<vmem>>, vector<1x4x128xbf16>
    %22 = vector.shape_cast %21 : vector<1x4x128xbf16> to vector<4x128xbf16>
    %cst_23 = arith.constant dense<0.000000e+00> : vector<16x128xf32>
    %23 = tpu.matmul %20, %22, %cst_23 {dimension_numbers = #tpu.dot_dimension_numbers<[1], [0], [0], [1], [0, 0, 1, 1], [], []>} : vector<16x4xbf16>, vector<4x128xbf16>, vector<16x128xf32> -> vector<16x128xf32>
    %24 = arith.addf %18, %23 : vector<16x128xf32>
    %c0_24 = arith.constant 0 : index
    %c4 = arith.constant 4 : index
    %c0_25 = arith.constant 0 : index
    %25 = vector.load %arg1[%c0_24, %c4, %c0_25] : memref<1x24x4xbf16, #tpu.memory_space<vmem>>, vector<1x16x4xbf16>
    %26 = vector.shape_cast %25 : vector<1x16x4xbf16> to vector<16x4xbf16>
    %c4_26 = arith.constant 4 : index
    %c0_27 = arith.constant 0 : index
    %c0_28 = arith.constant 0 : index
    %27 = vector.load %arg2[%c4_26, %c0_27, %c0_28] : memref<9x4x128xbf16, #tpu.memory_space<vmem>>, vector<1x4x128xbf16>
    %28 = vector.shape_cast %27 : vector<1x4x128xbf16> to vector<4x128xbf16>
    %cst_29 = arith.constant dense<0.000000e+00> : vector<16x128xf32>
    %29 = tpu.matmul %26, %28, %cst_29 {dimension_numbers = #tpu.dot_dimension_numbers<[1], [0], [0], [1], [0, 0, 1, 1], [], []>} : vector<16x4xbf16>, vector<4x128xbf16>, vector<16x128xf32> -> vector<16x128xf32>
    %30 = arith.addf %24, %29 : vector<16x128xf32>
    %c0_30 = arith.constant 0 : index
    %c0_31 = arith.constant 0 : index
    %31 = vector.load %arg6[%c0_30, %c0_31] : memref<4x128xbf16, #tpu.memory_space<vmem>>, vector<4x128xbf16>
    %cst_32 = arith.constant dense<0.000000e+00> : vector<16x128xf32>
    %32 = tpu.matmul %26, %31, %cst_32 {dimension_numbers = #tpu.dot_dimension_numbers<[1], [0], [0], [1], [0, 0, 1, 1], [], []>} : vector<16x4xbf16>, vector<4x128xbf16>, vector<16x128xf32> -> vector<16x128xf32>
    %c0_33 = arith.constant 0 : index
    %c5 = arith.constant 5 : index
    %c0_34 = arith.constant 0 : index
    %33 = vector.load %arg1[%c0_33, %c5, %c0_34] : memref<1x24x4xbf16, #tpu.memory_space<vmem>>, vector<1x16x4xbf16>
    %34 = vector.shape_cast %33 : vector<1x16x4xbf16> to vector<16x4xbf16>
    %c5_35 = arith.constant 5 : index
    %c0_36 = arith.constant 0 : index
    %c0_37 = arith.constant 0 : index
    %35 = vector.load %arg2[%c5_35, %c0_36, %c0_37] : memref<9x4x128xbf16, #tpu.memory_space<vmem>>, vector<1x4x128xbf16>
    %36 = vector.shape_cast %35 : vector<1x4x128xbf16> to vector<4x128xbf16>
    %cst_38 = arith.constant dense<0.000000e+00> : vector<16x128xf32>
    %37 = tpu.matmul %34, %36, %cst_38 {dimension_numbers = #tpu.dot_dimension_numbers<[1], [0], [0], [1], [0, 0, 1, 1], [], []>} : vector<16x4xbf16>, vector<4x128xbf16>, vector<16x128xf32> -> vector<16x128xf32>
    %38 = arith.addf %30, %37 : vector<16x128xf32>
    %c0_39 = arith.constant 0 : index
    %c6 = arith.constant 6 : index
    %c0_40 = arith.constant 0 : index
    %39 = vector.load %arg1[%c0_39, %c6, %c0_40] : memref<1x24x4xbf16, #tpu.memory_space<vmem>>, vector<1x16x4xbf16>
    %40 = vector.shape_cast %39 : vector<1x16x4xbf16> to vector<16x4xbf16>
    %c6_41 = arith.constant 6 : index
    %c0_42 = arith.constant 0 : index
    %c0_43 = arith.constant 0 : index
    %41 = vector.load %arg2[%c6_41, %c0_42, %c0_43] : memref<9x4x128xbf16, #tpu.memory_space<vmem>>, vector<1x4x128xbf16>
    %42 = vector.shape_cast %41 : vector<1x4x128xbf16> to vector<4x128xbf16>
    %cst_44 = arith.constant dense<0.000000e+00> : vector<16x128xf32>
    %43 = tpu.matmul %40, %42, %cst_44 {dimension_numbers = #tpu.dot_dimension_numbers<[1], [0], [0], [1], [0, 0, 1, 1], [], []>} : vector<16x4xbf16>, vector<4x128xbf16>, vector<16x128xf32> -> vector<16x128xf32>
    %44 = arith.addf %38, %43 : vector<16x128xf32>
    %c0_45 = arith.constant 0 : index
    %c7 = arith.constant 7 : index
    %c0_46 = arith.constant 0 : index
    %45 = vector.load %arg1[%c0_45, %c7, %c0_46] : memref<1x24x4xbf16, #tpu.memory_space<vmem>>, vector<1x16x4xbf16>
    %46 = vector.shape_cast %45 : vector<1x16x4xbf16> to vector<16x4xbf16>
    %c7_47 = arith.constant 7 : index
    %c0_48 = arith.constant 0 : index
    %c0_49 = arith.constant 0 : index
    %47 = vector.load %arg2[%c7_47, %c0_48, %c0_49] : memref<9x4x128xbf16, #tpu.memory_space<vmem>>, vector<1x4x128xbf16>
    %48 = vector.shape_cast %47 : vector<1x4x128xbf16> to vector<4x128xbf16>
    %cst_50 = arith.constant dense<0.000000e+00> : vector<16x128xf32>
    %49 = tpu.matmul %46, %48, %cst_50 {dimension_numbers = #tpu.dot_dimension_numbers<[1], [0], [0], [1], [0, 0, 1, 1], [], []>} : vector<16x4xbf16>, vector<4x128xbf16>, vector<16x128xf32> -> vector<16x128xf32>
    %50 = arith.addf %44, %49 : vector<16x128xf32>
    %c0_51 = arith.constant 0 : index
    %c8 = arith.constant 8 : index
    %c0_52 = arith.constant 0 : index
    %51 = vector.load %arg1[%c0_51, %c8, %c0_52] : memref<1x24x4xbf16, #tpu.memory_space<vmem>>, vector<1x16x4xbf16>
    %52 = vector.shape_cast %51 : vector<1x16x4xbf16> to vector<16x4xbf16>
    %c8_53 = arith.constant 8 : index
    %c0_54 = arith.constant 0 : index
    %c0_55 = arith.constant 0 : index
    %53 = vector.load %arg2[%c8_53, %c0_54, %c0_55] : memref<9x4x128xbf16, #tpu.memory_space<vmem>>, vector<1x4x128xbf16>
    %54 = vector.shape_cast %53 : vector<1x4x128xbf16> to vector<4x128xbf16>
    %cst_56 = arith.constant dense<0.000000e+00> : vector<16x128xf32>
    %55 = tpu.matmul %52, %54, %cst_56 {dimension_numbers = #tpu.dot_dimension_numbers<[1], [0], [0], [1], [0, 0, 1, 1], [], []>} : vector<16x4xbf16>, vector<4x128xbf16>, vector<16x128xf32> -> vector<16x128xf32>
    %56 = arith.addf %50, %55 : vector<16x128xf32>
    %c0_57 = arith.constant 0 : index
    %c0_58 = arith.constant 0 : index
    %57 = vector.load %arg3[%c0_57, %c0_58] : memref<1x128xf32, #tpu.memory_space<vmem>>, vector<1x128xf32>
    %58 = vector.broadcast %57 : vector<1x128xf32> to vector<16x128xf32>
    %59 = arith.addf %56, %58 : vector<16x128xf32>
    %cst_59 = arith.constant 0.000000e+00 : f32
    %60 = vector.broadcast %cst_59 : f32 to vector<16x128xf32>
    %61 = arith.maximumf %59, %60 : vector<16x128xf32>
    %cst_60 = arith.constant 0.000000e+00 : bf16
    %62 = vector.broadcast %cst_60 : bf16 to vector<24x128xbf16>
    %c0_61 = arith.constant 0 : index
    %c0_62 = arith.constant 0 : index
    %63 = vector.load %arg8[%c0_61, %c0_62] : memref<24x128xbf16, #tpu.memory_space<vmem>>, vector<24x128xbf16>
    tpu.vector_store %arg8[%c0_61, %c0_62], %62 {strides = array<i32>} : memref<24x128xbf16, #tpu.memory_space<vmem>>, vector<24x128xbf16>,
    %64 = arith.truncf %61 : vector<16x128xf32> to vector<16x128xbf16>
    %c4_63 = arith.constant 4 : index
    %c0_64 = arith.constant 0 : index
    %65 = vector.load %arg8[%c4_63, %c0_64] : memref<24x128xbf16, #tpu.memory_space<vmem>>, vector<16x128xbf16>
    tpu.vector_store %arg8[%c4_63, %c0_64], %64 {strides = array<i32>} : memref<24x128xbf16, #tpu.memory_space<vmem>>, vector<16x128xbf16>,
    %c0_65 = arith.constant 0 : index
    %c0_66 = arith.constant 0 : index
    %66 = vector.load %arg5[%c0_65, %c0_66] : memref<1x128xf32, #tpu.memory_space<vmem>>, vector<1x128xf32>
    %67 = vector.broadcast %66 : vector<1x128xf32> to vector<16x128xf32>
    %68 = arith.addf %32, %67 : vector<16x128xf32>
    %c0_67 = arith.constant 0 : index
    %c0_68 = arith.constant 0 : index
    %69 = vector.load %arg8[%c0_67, %c0_68] : memref<24x128xbf16, #tpu.memory_space<vmem>>, vector<16x128xbf16>
    %c0_69 = arith.constant 0 : index
    %c0_70 = arith.constant 0 : index
    %c0_71 = arith.constant 0 : index
    %70 = vector.load %arg4[%c0_69, %c0_70, %c0_71] : memref<9x128x128xbf16, #tpu.memory_space<vmem>>, vector<1x128x128xbf16>
    %71 = vector.shape_cast %70 : vector<1x128x128xbf16> to vector<128x128xbf16>
    %cst_72 = arith.constant dense<0.000000e+00> : vector<16x128xf32>
    %72 = tpu.matmul %69, %71, %cst_72 {dimension_numbers = #tpu.dot_dimension_numbers<[1], [0], [0], [1], [0, 0, 1, 1], [], []>} : vector<16x128xbf16>, vector<128x128xbf16>, vector<16x128xf32> -> vector<16x128xf32>
    %73 = arith.addf %68, %72 : vector<16x128xf32>
    %c1_73 = arith.constant 1 : index
    %c0_74 = arith.constant 0 : index
    %74 = vector.load %arg8[%c1_73, %c0_74] : memref<24x128xbf16, #tpu.memory_space<vmem>>, vector<16x128xbf16>
    %c1_75 = arith.constant 1 : index
    %c0_76 = arith.constant 0 : index
    %c0_77 = arith.constant 0 : index
    %75 = vector.load %arg4[%c1_75, %c0_76, %c0_77] : memref<9x128x128xbf16, #tpu.memory_space<vmem>>, vector<1x128x128xbf16>
    %76 = vector.shape_cast %75 : vector<1x128x128xbf16> to vector<128x128xbf16>
    %cst_78 = arith.constant dense<0.000000e+00> : vector<16x128xf32>
    %77 = tpu.matmul %74, %76, %cst_78 {dimension_numbers = #tpu.dot_dimension_numbers<[1], [0], [0], [1], [0, 0, 1, 1], [], []>} : vector<16x128xbf16>, vector<128x128xbf16>, vector<16x128xf32> -> vector<16x128xf32>
    %78 = arith.addf %73, %77 : vector<16x128xf32>
    %c2_79 = arith.constant 2 : index
    %c0_80 = arith.constant 0 : index
    %79 = vector.load %arg8[%c2_79, %c0_80] : memref<24x128xbf16, #tpu.memory_space<vmem>>, vector<16x128xbf16>
    %c2_81 = arith.constant 2 : index
    %c0_82 = arith.constant 0 : index
    %c0_83 = arith.constant 0 : index
    %80 = vector.load %arg4[%c2_81, %c0_82, %c0_83] : memref<9x128x128xbf16, #tpu.memory_space<vmem>>, vector<1x128x128xbf16>
    %81 = vector.shape_cast %80 : vector<1x128x128xbf16> to vector<128x128xbf16>
    %cst_84 = arith.constant dense<0.000000e+00> : vector<16x128xf32>
    %82 = tpu.matmul %79, %81, %cst_84 {dimension_numbers = #tpu.dot_dimension_numbers<[1], [0], [0], [1], [0, 0, 1, 1], [], []>} : vector<16x128xbf16>, vector<128x128xbf16>, vector<16x128xf32> -> vector<16x128xf32>
    %83 = arith.addf %78, %82 : vector<16x128xf32>
    %c3_85 = arith.constant 3 : index
    %c0_86 = arith.constant 0 : index
    %84 = vector.load %arg8[%c3_85, %c0_86] : memref<24x128xbf16, #tpu.memory_space<vmem>>, vector<16x128xbf16>
    %c3_87 = arith.constant 3 : index
    %c0_88 = arith.constant 0 : index
    %c0_89 = arith.constant 0 : index
    %85 = vector.load %arg4[%c3_87, %c0_88, %c0_89] : memref<9x128x128xbf16, #tpu.memory_space<vmem>>, vector<1x128x128xbf16>
    %86 = vector.shape_cast %85 : vector<1x128x128xbf16> to vector<128x128xbf16>
    %cst_90 = arith.constant dense<0.000000e+00> : vector<16x128xf32>
    %87 = tpu.matmul %84, %86, %cst_90 {dimension_numbers = #tpu.dot_dimension_numbers<[1], [0], [0], [1], [0, 0, 1, 1], [], []>} : vector<16x128xbf16>, vector<128x128xbf16>, vector<16x128xf32> -> vector<16x128xf32>
    %88 = arith.addf %83, %87 : vector<16x128xf32>
    %c4_91 = arith.constant 4 : index
    %c0_92 = arith.constant 0 : index
    %89 = vector.load %arg8[%c4_91, %c0_92] : memref<24x128xbf16, #tpu.memory_space<vmem>>, vector<16x128xbf16>
    %c4_93 = arith.constant 4 : index
    %c0_94 = arith.constant 0 : index
    %c0_95 = arith.constant 0 : index
    %90 = vector.load %arg4[%c4_93, %c0_94, %c0_95] : memref<9x128x128xbf16, #tpu.memory_space<vmem>>, vector<1x128x128xbf16>
    %91 = vector.shape_cast %90 : vector<1x128x128xbf16> to vector<128x128xbf16>
    %cst_96 = arith.constant dense<0.000000e+00> : vector<16x128xf32>
    %92 = tpu.matmul %89, %91, %cst_96 {dimension_numbers = #tpu.dot_dimension_numbers<[1], [0], [0], [1], [0, 0, 1, 1], [], []>} : vector<16x128xbf16>, vector<128x128xbf16>, vector<16x128xf32> -> vector<16x128xf32>
    %93 = arith.addf %88, %92 : vector<16x128xf32>
    %c5_97 = arith.constant 5 : index
    %c0_98 = arith.constant 0 : index
    %94 = vector.load %arg8[%c5_97, %c0_98] : memref<24x128xbf16, #tpu.memory_space<vmem>>, vector<16x128xbf16>
    %c5_99 = arith.constant 5 : index
    %c0_100 = arith.constant 0 : index
    %c0_101 = arith.constant 0 : index
    %95 = vector.load %arg4[%c5_99, %c0_100, %c0_101] : memref<9x128x128xbf16, #tpu.memory_space<vmem>>, vector<1x128x128xbf16>
    %96 = vector.shape_cast %95 : vector<1x128x128xbf16> to vector<128x128xbf16>
    %cst_102 = arith.constant dense<0.000000e+00> : vector<16x128xf32>
    %97 = tpu.matmul %94, %96, %cst_102 {dimension_numbers = #tpu.dot_dimension_numbers<[1], [0], [0], [1], [0, 0, 1, 1], [], []>} : vector<16x128xbf16>, vector<128x128xbf16>, vector<16x128xf32> -> vector<16x128xf32>
    %98 = arith.addf %93, %97 : vector<16x128xf32>
    %c6_103 = arith.constant 6 : index
    %c0_104 = arith.constant 0 : index
    %99 = vector.load %arg8[%c6_103, %c0_104] : memref<24x128xbf16, #tpu.memory_space<vmem>>, vector<16x128xbf16>
    %c6_105 = arith.constant 6 : index
    %c0_106 = arith.constant 0 : index
    %c0_107 = arith.constant 0 : index
    %100 = vector.load %arg4[%c6_105, %c0_106, %c0_107] : memref<9x128x128xbf16, #tpu.memory_space<vmem>>, vector<1x128x128xbf16>
    %101 = vector.shape_cast %100 : vector<1x128x128xbf16> to vector<128x128xbf16>
    %cst_108 = arith.constant dense<0.000000e+00> : vector<16x128xf32>
    %102 = tpu.matmul %99, %101, %cst_108 {dimension_numbers = #tpu.dot_dimension_numbers<[1], [0], [0], [1], [0, 0, 1, 1], [], []>} : vector<16x128xbf16>, vector<128x128xbf16>, vector<16x128xf32> -> vector<16x128xf32>
    %103 = arith.addf %98, %102 : vector<16x128xf32>
    %c7_109 = arith.constant 7 : index
    %c0_110 = arith.constant 0 : index
    %104 = vector.load %arg8[%c7_109, %c0_110] : memref<24x128xbf16, #tpu.memory_space<vmem>>, vector<16x128xbf16>
    %c7_111 = arith.constant 7 : index
    %c0_112 = arith.constant 0 : index
    %c0_113 = arith.constant 0 : index
    %105 = vector.load %arg4[%c7_111, %c0_112, %c0_113] : memref<9x128x128xbf16, #tpu.memory_space<vmem>>, vector<1x128x128xbf16>
    %106 = vector.shape_cast %105 : vector<1x128x128xbf16> to vector<128x128xbf16>
    %cst_114 = arith.constant dense<0.000000e+00> : vector<16x128xf32>
    %107 = tpu.matmul %104, %106, %cst_114 {dimension_numbers = #tpu.dot_dimension_numbers<[1], [0], [0], [1], [0, 0, 1, 1], [], []>} : vector<16x128xbf16>, vector<128x128xbf16>, vector<16x128xf32> -> vector<16x128xf32>
    %108 = arith.addf %103, %107 : vector<16x128xf32>
    %c8_115 = arith.constant 8 : index
    %c0_116 = arith.constant 0 : index
    %109 = vector.load %arg8[%c8_115, %c0_116] : memref<24x128xbf16, #tpu.memory_space<vmem>>, vector<16x128xbf16>
    %c8_117 = arith.constant 8 : index
    %c0_118 = arith.constant 0 : index
    %c0_119 = arith.constant 0 : index
    %110 = vector.load %arg4[%c8_117, %c0_118, %c0_119] : memref<9x128x128xbf16, #tpu.memory_space<vmem>>, vector<1x128x128xbf16>
    %111 = vector.shape_cast %110 : vector<1x128x128xbf16> to vector<128x128xbf16>
    %cst_120 = arith.constant dense<0.000000e+00> : vector<16x128xf32>
    %112 = tpu.matmul %109, %111, %cst_120 {dimension_numbers = #tpu.dot_dimension_numbers<[1], [0], [0], [1], [0, 0, 1, 1], [], []>} : vector<16x128xbf16>, vector<128x128xbf16>, vector<16x128xf32> -> vector<16x128xf32>
    %113 = arith.addf %108, %112 : vector<16x128xf32>
    %cst_121 = arith.constant 0.000000e+00 : f32
    %114 = vector.broadcast %cst_121 : f32 to vector<16x128xf32>
    %115 = arith.maximumf %113, %114 : vector<16x128xf32>
    %c0_122 = arith.constant 0 : index
    %c0_123 = arith.constant 0 : index
    %c0_124 = arith.constant 0 : index
    %116 = vector.load %arg7[%c0_122, %c0_123, %c0_124] : memref<1x16x128xf32, #tpu.memory_space<vmem>>, vector<1x16x128xf32>
    %117 = vector.shape_cast %116 : vector<1x16x128xf32> to vector<16x128xf32>
    %118 = vector.shape_cast %115 : vector<16x128xf32> to vector<1x16x128xf32>
    tpu.vector_store %arg7[%c0_122, %c0_123, %c0_124], %118 {strides = array<i32>} : memref<1x16x128xf32, #tpu.memory_space<vmem>>, vector<1x16x128xf32>,
    return
  }
  func.func @transform_0(%arg0: i32) -> (i32, i32, i32) {
    %c0_i32 = arith.constant 0 : i32
    %c0_i32_0 = arith.constant 0 : i32
    %c0_i32_1 = arith.constant 0 : i32
    return %arg0, %c0_i32, %c0_i32_0 : i32, i32, i32
  }
  func.func @transform_1(%arg0: i32) -> (i32, i32, i32) {
    %c0_i32 = arith.constant 0 : i32
    %c0_i32_0 = arith.constant 0 : i32
    %c0_i32_1 = arith.constant 0 : i32
    %c0_i32_2 = arith.constant 0 : i32
    return %c0_i32, %c0_i32_0, %c0_i32_1 : i32, i32, i32
  }
  func.func @transform_2(%arg0: i32) -> (i32, i32) {
    %c0_i32 = arith.constant 0 : i32
    %c0_i32_0 = arith.constant 0 : i32
    %c0_i32_1 = arith.constant 0 : i32
    return %c0_i32, %c0_i32_0 : i32, i32
  }
  func.func @transform_3(%arg0: i32) -> (i32, i32, i32) {
    %c0_i32 = arith.constant 0 : i32
    %c0_i32_0 = arith.constant 0 : i32
    %c0_i32_1 = arith.constant 0 : i32
    %c0_i32_2 = arith.constant 0 : i32
    return %c0_i32, %c0_i32_0, %c0_i32_1 : i32, i32, i32
  }
  func.func @transform_4(%arg0: i32) -> (i32, i32) {
    %c0_i32 = arith.constant 0 : i32
    %c0_i32_0 = arith.constant 0 : i32
    %c0_i32_1 = arith.constant 0 : i32
    return %c0_i32, %c0_i32_0 : i32, i32
  }
  func.func @transform_5(%arg0: i32) -> (i32, i32) {
    %c0_i32 = arith.constant 0 : i32
    %c0_i32_0 = arith.constant 0 : i32
    %c0_i32_1 = arith.constant 0 : i32
    return %c0_i32, %c0_i32_0 : i32, i32
  }
  func.func @transform_6(%arg0: i32) -> (i32, i32, i32) {
    %c0_i32 = arith.constant 0 : i32
    %c0_i32_0 = arith.constant 0 : i32
    %c0_i32_1 = arith.constant 0 : i32
    return %arg0, %c0_i32, %c0_i32_0 : i32, i32, i32
  }
}

</mosaic_0001>

<bundles_post_ra>
// kernel: tpu_custom_call.1
= control target key start
LH: loop header
LB: loop body
LE: loop exit
PB: predicated region body
PF: predicated region fallthrough
CT: control target
= control target key end

     0   :  { %11 = vsyncpa [#allocation4], 0  ;;  %s3248_s0 = inlined_call_operand.vmem [shape: bf16[2,24,4], index: 0, kind: input, shape index: {}]   ;;  %s3249_s1 = inlined_call_operand.vmem [shape: bf16[9,4,128], index: 1, kind: input, shape index: {}]   ;;  %s3250_s2 = inlined_call_operand.vmem [shape: f32[1,128], index: 2, kind: input, shape index: {}]   ;;  %s3251_s3 = inlined_call_operand.hbm [shape: bf16[9,128,128], index: 3, kind: input, shape index: {}]   ;;  %s3252_s4 = inlined_call_operand.vmem [shape: f32[1,128], index: 4, kind: input, shape index: {}]   ;;  %s3253_s5 = inlined_call_operand.vmem [shape: bf16[4,128], index: 5, kind: input, shape index: {}]   ;;  %s3254_s6 = inlined_call_operand.hbm [shape: f32[2,16,128], index: 6, kind: output, shape index: {}]  }
   0x1   :  { %12 = vsyncpa [#allocation5], 0 }
   0x2   :  { %14 = vsyncpa [#allocation5 + $0x1], 0  ;;  %s2864_s21 = smov 0   ;;  %s2866_s22 = smov 0  }
   0x3   :  { %s2868_s23 = smov 0   ;;  %s2870_s24 = smov 0  }
   0x4 LB: > { %s2885_s25 = sadd.s32 4294967295, %s2818_s24   ;;  %s2109_s26 = sadd.s32 4294967294, %s2818_s24   ;;  %s2818_s24 = sphi %s2870_s24, %s3262_s24   ;;  %s2814_s23 = sphi %s2868_s23, %s3261_s23   ;;  %s2810_s22 = sphi %s2866_s22, %s3260_s22   ;;  %s2806_s21 = sphi %s2864_s21, %s3259_s21  }
   0x5   : > { %s2889_s27 = sadd.s32 1, %s2818_s24   ;;  %s158_s28 = sadd.s32 1, %s2814_s23 }
   0x6   : > { %s155_s29 = ssub.s32 %s2818_s24, %s2889_s27  ;;  %p168_p0 = scmp.ne.s32.totalorder %s2814_s23, %s2810_s22 }
   0x7   : > { %p156_p1 = scmp.eq.s32.totalorder %s155_s29, 0  ;;  %p169_p2 = scmp.eq.s32.totalorder %s2885_s25, 1 }
   0x8   : > { %p174_p3 = scmp.ne.s32.totalorder %s2810_s22, %s2806_s21  ;;  %p175_p4 = scmp.eq.s32.totalorder %s2109_s26, 1 }
   0x9   : > { %s2900_s30 = scalar_select %p156_p1, %s2814_s23, %s158_s28  }
   0xa   : > { %p2902_p5 = por %p169_p2, %p168_p0  ;;  %p2906_p6 = por %p175_p4, %p174_p3 }
   0xb   : > { %p2110_p7 = scmp.ge.s32.totalorder %s2818_s24, 1  ;;  %p182_p8 = scmp.lt.s32.totalorder %s2818_s24, 3 }
   0xc   : > { %s3256_s8 = scalar_select %p2906_p6, 1, 0 }
   0xd   : > { %p2594_p9 = scmp.eq.s32.totalorder %s2885_s25, 0  ;;  %p2913_p10 = pnand %p2110_p7, %p182_p8 }
   0xe   : > { %s2820_s10 = smov [#allocation3]  }
   0xf   : > { %s200_s11 = sshll.u32 %s2820_s10, 4  ;;  %p2586_p11 = pneg %p2913_p10  ;;  %s201_s11 = int_to_ptr.vmem [resolvable:$true] %s200_s11 }
  0x10   : > { %s2739_s12 = scalar_lea.vmem %s201_s11, 9216  ;;  %p2747_p3 = scmp.lt.s32.totalorder %s201_s11, %s201_s11 }
  0x11   : > { %p2587_p12 = pnand %p2594_p9, %p2586_p11  ;;  %p2740_p0 = scmp.ne.s32.totalorder %s201_s11, %s2739_s12 }
  0x12   : > { %p2748_p4 = scmp.lt.s32.totalorder %s2739_s12, %s2739_s12 }
  0x13   : > { %p2730_p13 = pneg %p2587_p12 }
  0x14   : > { %p2749_p6 = por %p2748_p4, %p2747_p3 }
  0x15   : > { %p2742_p1 = pnand %p2740_p0, %p2730_p13 }
  0x17   : > { %p2743_p2 = pneg %p2742_p1 }
  0x19   : > { %p2750_p7 = pnand %p2749_p6, %p2743_p2 }
  0x1b   : > { %2753 = shalt.err (!%p2750_p7)
}
  0x1c   : > { %s2821_s13 = smov 64   ;;  %s2822_s14 = smov 4  }
  0x1d   : > { %2589 = dma.hbm_to_vmem [thread:$0]  (!%p2587_p12), %s3251_s3, 9216, %s201_s11, [#allocation4], %s2821_s13, %s2821_s13, %s2822_s14  }
  0x1e   : > { %230 = sbr.rel (%p2913_p10) target bundleno = 654 (0x28e), region = 44 }
  0x23   : > { %2797 = dma.done.wait (%p2594_p9), [#allocation4], 9216  }
  0x24   : > { %2799 = vsyncadd (%p2594_p9), [#allocation4], 4294958080  ;;  %p260_p8 = scmp.lt.s32.totalorder %s2885_s25, 1  ;;  %v2823_v0 = vmov 0.0   ;;  %vm2824_vm0 = vmmov 0   ;;  %vm297_vm1 = vcmask 1041408  }
  0x25   : > { %2339 = vmatprep.subr.bf16.mxu1 %v2823_v0  ;;  %2341 = vmatprep.mubr.msk.bf16.mxu1 %vm2824_vm0, %v2823_v0  ;;  %v2117_v1 = vld [vmem:[%s3249_s1 + $0x2] sm:$0x3]  ;;  %vm280_vm2 = vsmask.f32 7424  ;;  %v268_v7 = vld [vmem:[%s3249_s1] sm:$0x3] }
  0x26   : > { %s261_s17 = scalar_select %p260_p8, %s2885_s25, 1  ;;  %2363 = vmatprep.subr.bf16.mxu0 %v2823_v0  ;;  %2365 = vmatprep.mubr.msk.bf16.mxu0 %vm2824_vm0, %v2823_v0  ;;  %v299_v4 = vsel %vm297_vm1, %v2117_v1, 0  ;;  %vm293_vm3 = vcmask 31744   ;;  %v2122_v12 = vld [vmem:[%s3249_s1 + $0x4] sm:$0x3]  ;;  %v345_v13 = vsel %vm297_vm1, %v268_v7, 0 }
  0x27   : > { %2340 = vmatpush3.bf16.msra.mxu1 %v299_v4  ;;  %v2125_v14 = vld [vmem:[%s3249_s1 + $0x6] sm:$0x3]  ;;  %v2128_v15 = vld [vmem:[%s3249_s1 + $0x8] sm:$0x3]  ;;  %vm526_vm4 = vcmask 1045504   ;;  %v402_v20 = vsel %vm297_vm1, %v2122_v12, 0 }
  0x28   : > { %s2579_s18 = smul.u32 12, %s261_s17  ;;  %2345 = vmatprep.subr.bf16.mxu1 %v2823_v0  ;;  %v534_v19 = vsel %vm297_vm1, %v2128_v15, 0  ;;  %vm659_vm5 = vcmask 1044480   ;;  %v2134_v27 = vld [vmem:[%s3249_s1 + $0xc] sm:$0x3]  ;;  %v475_v34 = vsel %vm297_vm1, %v2125_v14, 0 }
  0x29   : > { %2364 = vmatpush3.bf16.msra.mxu0 %v534_v19  ;;  %v2131_v38 = vld [vmem:[%s3249_s1 + $0xa] sm:$0x3]  ;;  %v667_v39 = vsel %vm297_vm1, %v2134_v27, 0  ;;  %v2137_v45 = vld [vmem:[%s3249_s1 + $0xe] sm:$0x3]  ;;  %vm394_vm6 = vcmask 1046528  }
  0x2a   : > { %s2941_s26 = scalar_lea.vmem %s3248_s0, %s2579_s18  ;;  %2375 = vmatprep.subr.bf16.mxu0 %v2823_v0  ;;  %v2140_v46 = vld [vmem:[%s3249_s1 + $0x10] sm:$0x3]  ;;  %v608_v52 = vsel %vm297_vm1, %v2131_v38, 0  ;;  %v740_v58 = vsel %vm297_vm1, %v2137_v45, 0  ;;  %vm453_vm7 = vsmask.f32 6400 }
  0x2b   : > { %v266_v2 = vld [vmem:[%s2941_s26] sm:$0xf]  ;;  %v2948_v3 = vld [vmem:[%s2941_s26 + $0x4] sm:$0xf]  ;;  %v712_v51 = vld [vmem:[%s2941_s26 + $0x8] sm:$0xf] }
  0x2c   : > { %v2952_v5 = vcombine.low %v266_v2, %v2948_v3  ;;  %v2955_v6 = vld [vmem:[%s2941_s26 + $0x8] ss:$0 sps:$4 sm:$0x11]   ;;  %v388_v8 = vld [vmem:[%s2941_s26] sm:$0xe]  ;;  %v792_v59 = vsel %vm297_vm1, %v2140_v46, 0  ;;  %v2138_v62 = vcombine.low %v712_v51, %v712_v51  ;;  %v2141_v12 = vcombine.low %v2948_v3, %v712_v51 }
  0x2d   : > { %v289_v11 = vshll.u32 %v2955_v6, 16  ;;  %v2976_v18 = vcombine.low %v388_v8, %v2948_v3  ;;  %v2640_v21 = vld [vmem:[%s2941_s26 + $0x8] ss:$0 sps:$4 sm:$0x33]   ;;  %v520_v22 = vld [vmem:[%s2941_s26] sm:$0xc] }
  0x2e   : > { %v282_v9 = vshrl.u32 %v2952_v5, 16  ;;  %v284_v10 = vshll.u32 %v2952_v5, 16  ;;  %v2129_v24 = vcombine.low %v520_v22, %v2948_v3  ;;  %v396_v28 = vrot.slane %v2955_v6, 1  ;;  %v2642_v36 = vld [vmem:[%s2941_s26 + $0x8] ss:$0 sps:$4 sm:$0x77]  }
  0x2f   : > { %v291_v17 = vrot.slane %v289_v11, 1  ;;  %v455_v25 = vshrl.u32 %v2976_v18, 16  ;;  %v458_v26 = vshll.u32 %v2976_v18, 16  ;;  %v528_v29 = vrot.slane %v2640_v21, 2  ;;  %v653_v40 = vld [vmem:[%s2941_s26] sm:$0x8] }
  0x30   : > { %v286_v16 = vrot.slane %v284_v10, 1  ;;  %v463_v30 = vshrl.u32 %v2640_v21, 16  ;;  %v466_v31 = vshll.u32 %v2640_v21, 16  ;;  %v395_v33 = vrot.slane %v2976_v18, 1  ;;  %v579_v21 = vld [vmem:[%s3253_s5] sm:$0x3] }
  0x31   : > { %v527_v35 = vrot.slane %v2129_v24, 2  ;;  %v2995_v37 = vrot.slane %v455_v25, 1  ;;  %v460_v42 = vrot.slane %v458_v26, 2  ;;  %v2135_v44 = vcombine.low %v653_v40, %v2948_v3  ;;  %v2647_v22 = vld [vmem:[#allocation3 + $0x30] sm:$0xff]   ;;  %v2649_v25 = vld [vmem:[#allocation3 + $0x28] sm:$0xff]   ;;  %v2651_v27 = vld [vmem:[#allocation3 + $0x20] sm:$0xff]  }
  0x32   : > { %v287_v23 = vor.u32 %v286_v16, %v282_v9  ;;  %v465_v43 = vrot.slane %v463_v30, 1  ;;  %v468_v47 = vrot.slane %v466_v31, 2  ;;  %v588_v48 = vshrl.u32 %v2129_v24, 16  ;;  %v2650_v26 = vld [vmem:[#allocation3 + $0x70] sm:$0xff]   ;;  %v2653_v30 = vld [vmem:[#allocation3 + $0x18] sm:$0xff]   ;;  %v2654_v31 = vld [vmem:[#allocation3 + $0x60] sm:$0xff]  }
  0x33   : > { %v3005_v41 = vsel %vm526_vm4, %v527_v35, %v528_v29  ;;  %v591_v49 = vshll.u32 %v2129_v24, 16  ;;  %v596_v50 = vshrl.u32 %v2642_v36, 16  ;;  %v660_v53 = vrot.slane %v2135_v44, 3  ;;  %v2648_v24 = vld [vmem:[#allocation3 + $0x78] sm:$0xff]   ;;  %v2652_v29 = vld [vmem:[#allocation3 + $0x68] sm:$0xff]   ;;  %v2658_v35 = vld [vmem:[#allocation3 + $0x50] sm:$0xff]  }
  0x34   : > { %v292_v32 = vsel %vm280_vm2, %v287_v23, %v291_v17  ;;  %2366 = vmatmul.mubr.msk.bf16.vlgmr.msra.gmra.mxu0 %vm293_vm3, %v3005_v41  ;;  %v661_v54 = vrot.slane %v2642_v36, 3  ;;  %v599_v55 = vshll.u32 %v2642_v36, 16  ;;  %v590_v56 = vrot.slane %v588_v48, 2  ;;  %v2659_v36 = vld [vmem:[#allocation3] sm:$0xff]   ;;  %s257_s16 = sand.u32 1, %s2810_s22   ;;  %s2237_s20 = sshll.u32 %s2885_s25, 8 }
  0x35   : > { %2342 = vmatmul.mubr.msk.bf16.vlgmr.msra.gmra.mxu1 %vm293_vm3, %v292_v32  ;;  %2376 = vmatpush3.bf16.msra.mxu0 %v667_v39  ;;  %v593_v57 = vrot.slane %v591_v49, 3  ;;  %v598_v60 = vrot.slane %v596_v50, 2  ;;  %v720_v63 = vshrl.u32 %v2135_v44, 16  ;;  %v723_v1 = vshll.u32 %v2135_v44, 16  ;;  %v2655_v32 = vld [vmem:[#allocation3 + $0x10] sm:$0xff]   ;;  %v2663_v38 = vld [vmem:[#allocation3 + $0x40] sm:$0xff]   ;;  %s3206_s9 = scalar_lea.hbm %s3254_s6, %s2237_s20 }
  0x36   : > { %2346 = vmatpush3.bf16.msra.mxu1 %v345_v13  ;;  %2347 = vmatprep.mubr.msk.bf16.mxu1 %vm2824_vm0, %v2823_v0  ;;  %v601_v61 = vrot.slane %v599_v55, 3  ;;  %v662_v2 = vsel %vm659_vm5, %v660_v53, %v661_v54  ;;  %v728_v4 = vshrl.u32 %v2138_v62, 16  ;;  %v731_v7 = vshll.u32 %v2138_v62, 16  ;;  %s2115_s17 = sshll.u32 %s257_s16, 4  ;;  %s3208_s10 = scalar_lea.sflag [#allocation5], %s257_s16 }
  0x37   : > { %2351 = vmatprep.subr.bf16.mxu1 %v2823_v0  ;;  %2377 = vmatprep.mubr.msk.bf16.mxu0 %vm2824_vm0, %v2823_v0  ;;  %v722_v8 = vrot.slane %v720_v63, 3  ;;  %v725_v9 = vrot.slane %v723_v1, 4  ;;  %v461_v13 = vor.u32 %v460_v42, %v2995_v37  ;;  %v469_v14 = vor.u32 %v468_v47, %v465_v43  ;;  %v2660_v37 = vld [vmem:[#allocation3 + $0x48] sm:$0xff]   ;;  %s259_s18 = scalar_lea.vmem [#allocation6], %s2115_s17  ;;  %s2826_s25 = smov [#allocation6]  }
  0x38   : > { %2387 = vmatprep.subr.bf16.mxu0 %v2823_v0  ;;  %v730_v10 = vrot.slane %v728_v4, 3  ;;  %v733_v11 = vrot.slane %v731_v7, 4  ;;  %vm586_vm8 = vsmask.f32 5376  ;;  %v594_v3 = vor.u32 %v593_v57, %v590_v56  ;;  %s2035_s19 = sshll.u32 %s259_s18, 4  ;;  %s2758_s11 = sshll.u32 %s2826_s25, 4  ;;  %s3201_s19 = int_to_ptr.vmem [resolvable:$true] %s2035_s19  ;;  %s2759_s11 = int_to_ptr.vmem [resolvable:$false] %s2758_s11 }
  0x39   : > { %v470_v6 = vsel %vm453_vm7, %v461_v13, %v469_v14  ;;  %v602_v15 = vor.u32 %v601_v61, %v598_v60  ;;  %vm718_vm9 = vsmask.f32 4352  ;;  %v726_v17 = vor.u32 %v725_v9, %v722_v8  ;;  %s2754_s26 = scalar_lea.vmem %s3201_s19, 256  ;;  %s2760_s12 = scalar_lea.vmem %s2759_s11, 512 }
  0x3a   : > { %v734_v18 = vor.u32 %v733_v11, %v730_v10  ;;  %v879_v23 = vsel %vm297_vm1, %v579_v21, 0  ;;  %v2143_v21 = vld [vmem:[%s3250_s2] ss:$0 sm:$0xff]  ;;  %vm858_vm10 = vcmask 1045508   ;;  %p2755_p6 = scmp.ne.s32.totalorder %s3201_s19, %s2754_s26  ;;  %p2761_p11 = scmp.lt.s32.totalorder %s3201_s19, %s2759_s11 }
  0x3b   : > { %v603_v16 = vsel %vm586_vm8, %v594_v3, %v602_v15  ;;  %vm859_vm11 = vmor %vm297_vm1, %vm858_vm10  ;;  %p2762_p12 = scmp.lt.s32.totalorder %s2760_s12, %s2754_s26 }
  0x3c   : > { %2378 = vmatmul.mubr.msk.bf16.vlgmr.msra.gmra.mxu0 %vm293_vm3, %v662_v2  ;;  %v735_v19 = vsel %vm718_vm9, %v726_v17, %v734_v18  ;;  %p2756_p9 = pnand %p2755_p6, %p2902_p5 }
  0x3d   : > { %2348 = vmatmul.mubr.msk.bf16.vlgmr.msra.gmra.mxu1 %vm293_vm3, %v2952_v5  ;;  %2388 = vmatpush3.bf16.msra.mxu0 %v792_v59  ;;  %v397_v5 = vsel %vm394_vm6, %v395_v33, %v396_v28  ;;  %v2825_v28 = vmov 0   ;;  %v2656_v33 = vld [vmem:[#allocation3 + $0x58] sm:$0xff]   ;;  %p2763_p13 = por %p2762_p12, %p2761_p11 }
  0x3e   : > { %2352 = vmatpush3.bf16.msra.mxu1 %v402_v20  ;;  %2353 = vmatprep.mubr.msk.bf16.mxu1 %vm2824_vm0, %v2823_v0  ;;  %v2646_v20 = vld [vmem:[#allocation3 + $0x38] sm:$0xff]   ;;  %848 = vst [vmem:[#allocation2] sm:$0xf] %v2825_v28  ;;  %849 = vst [vmem:[#allocation2 + $0x4] sm:$0xf] %v2825_v28  ;;  %p2757_p10 = pneg %p2756_p9 }
  0x3f   : > { %2357 = vmatprep.subr.bf16.mxu1 %v2823_v0  ;;  %2389 = vmatprep.mubr.msk.bf16.mxu0 %vm2824_vm0, %v2823_v0  ;;  %850 = vst [vmem:[#allocation2 + $0x8] sm:$0xf] %v2825_v28 }
  0x40   : > { %2399 = vmatprep.subr.bf16.mxu0 %v2823_v0  ;;  %p2764_p0 = pnand %p2763_p13, %p2757_p10 }
  0x44   : > { %2390 = vmatmul.mubr.msk.bf16.vlgmr.msra.gmra.mxu0 %vm293_vm3, %v2141_v12 }
  0x45   : > { %2354 = vmatmul.mubr.msk.bf16.vlgmr.msra.gmra.mxu1 %vm293_vm3, %v397_v5  ;;  %2415 = vmatprep.mubr.msk.bf16.mxu0 %vm2824_vm0, %v2823_v0 }
  0x46   : > { %2358 = vmatpush3.bf16.msra.mxu1 %v475_v34  ;;  %2359 = vmatprep.mubr.msk.bf16.mxu1 %vm2824_vm0, %v2823_v0  ;;  %v2657_v34 = vld [vmem:[#allocation3 + $0x8] sm:$0xff]  }
  0x47   : > { %2369 = vmatprep.subr.bf16.mxu1 %v2823_v0  ;;  %2400 = vmatpush3.bf16.msra.mxu0 %v2646_v20 }
  0x48   : > { %2401 = vmatprep.subr.bf16.mxu0 %v2823_v0 }
  0x4b   : > { %2402 = vmatpush3.bf16.msra.mxu0 %v2647_v22 }
  0x4c   : > { %2403 = vmatprep.subr.bf16.mxu0 %v2823_v0 }
  0x4d   : > { %2360 = vmatmul.mubr.msk.bf16.vlgmr.msra.gmra.mxu1 %vm293_vm3, %v470_v6 }
  0x4e   : > { %2370 = vmatpush3.bf16.msra.mxu1 %v608_v52  ;;  %2371 = vmatprep.mubr.msk.bf16.mxu1 %vm2824_vm0, %v2823_v0 }
  0x4f   : > { %2381 = vmatprep.subr.bf16.mxu1 %v2823_v0  ;;  %2404 = vmatpush3.bf16.msra.mxu0 %v2649_v25 }
  0x50   : > { %2405 = vmatprep.subr.bf16.mxu0 %v2823_v0 }
  0x53   : > { %2406 = vmatpush3.bf16.msra.mxu0 %v2651_v27 }
  0x54   : > { %2407 = vmatprep.subr.bf16.mxu0 %v2823_v0 }
  0x55   : > { %2372 = vmatmul.mubr.msk.bf16.vlgmr.msra.gmra.mxu1 %vm293_vm3, %v603_v16 }
  0x56   : > { %2382 = vmatpush3.bf16.msra.mxu1 %v740_v58  ;;  %2383 = vmatprep.mubr.msk.bf16.mxu1 %vm2824_vm0, %v2823_v0 }
  0x57   : > { %2393 = vmatprep.subr.bf16.mxu1 %v2823_v0  ;;  %2408 = vmatpush3.bf16.msra.mxu0 %v2653_v30 }
  0x58   : > { %2409 = vmatprep.subr.bf16.mxu0 %v2823_v0 }
  0x5b   : > { %2410 = vmatpush3.bf16.msra.mxu0 %v2655_v32 }
  0x5c   : > { %2411 = vmatprep.subr.bf16.mxu0 %v2823_v0 }
  0x5d   : > { %2384 = vmatmul.mubr.msk.bf16.vlgmr.msra.gmra.mxu1 %vm293_vm3, %v735_v19 }
  0x5e   : > { %2395 = vmatprep.mubr.msk.bf16.mxu1 %vm2824_vm0, %v2823_v0  ;;  %2394 = vmatpush3.bf16.msra.mxu1 %v879_v23 }
  0x5f   : > { %2419 = vmatprep.subr.bf16.mxu1 %v2823_v0  ;;  %2412 = vmatpush3.bf16.msra.mxu0 %v2657_v34 }
  0x60   : > { %2413 = vmatprep.subr.bf16.mxu0 %v2823_v0 }
  0x63   : > { %2414 = vmatpush3.bf16.msra.mxu0 %v2659_v36 }
  0x64   : > { %2439 = vmatprep.subr.bf16.mxu0 %v2823_v0 }
  0x65   : > { %2396 = vmatmul.mubr.msk.bf16.vlgmr.msra.gmra.mxu1 %vm293_vm3, %v3005_v41 }
  0x66   : > { %2420 = vmatpush3.bf16.msra.mxu1 %v2648_v24  ;;  %2435 = vmatprep.mubr.msk.bf16.mxu1 %vm2824_vm0, %v2823_v0 }
  0x67   : > { %2421 = vmatprep.subr.bf16.mxu1 %v2823_v0 }
  0x6a   : > { %2422 = vmatpush3.bf16.msra.mxu1 %v2650_v26 }
  0x6b   : > { %2423 = vmatprep.subr.bf16.mxu1 %v2823_v0 }
  0x6e   : > { %2424 = vmatpush3.bf16.msra.mxu1 %v2652_v29 }
  0x6f   : > { %2425 = vmatprep.subr.bf16.mxu1 %v2823_v0 }
  0x72   : > { %2426 = vmatpush3.bf16.msra.mxu1 %v2654_v31 }
  0x73   : > { %2427 = vmatprep.subr.bf16.mxu1 %v2823_v0 }
  0x76   : > { %2428 = vmatpush3.bf16.msra.mxu1 %v2656_v33 }
  0x77   : > { %2429 = vmatprep.subr.bf16.mxu1 %v2823_v0 }
  0x7a   : > { %2430 = vmatpush3.bf16.msra.mxu1 %v2658_v35 }
  0x7b   : > { %2431 = vmatprep.subr.bf16.mxu1 %v2823_v0 }
  0x7e   : > { %2432 = vmatpush3.bf16.msra.mxu1 %v2660_v37 }
  0x7f   : > { %2433 = vmatprep.subr.bf16.mxu1 %v2823_v0 }
  0x82   : > { %2434 = vmatpush3.bf16.msra.mxu1 %v2663_v38 }
  0x83   : > { %2459 = vmatprep.subr.bf16.mxu1 %v2823_v0 }
  0xf4   : > { %v570_v41 = vpop.f32.mrf.mxu0 }
  0xf5   : > { %v335_v39 = vpop.f32.mrf.mxu1 }
  0xf6   : > { %v2367_v43 = vpop.f32.mrf.mxu0 }
  0xf7   : > { %v2343_v40 = vpop.f32.mrf.mxu1 }
  0xf8   : > { %v573_v45 = vpop.f32.mrf.mxu0  ;;  %v2662_v40 = vld [vmem:[#allocation3 + $0xb8] sm:$0xff]  }
  0xf9   : > { %v338_v42 = vpop.f32.mrf.mxu1 }
  0xfa   : > { %v2368_v47 = vpop.f32.mrf.mxu0 }
  0xfb   : > { %v2344_v44 = vpop.f32.mrf.mxu1 }
  0xfc   : > { %v703_v49 = vpop.f32.mrf.mxu0 }
  0xfd   : > { %v381_v46 = vpop.f32.mrf.mxu1 }
  0xfe   : > { %v2379_v51 = vpop.f32.mrf.mxu0  ;;  %v382_v1 = vadd.f32 %v381_v46, %v335_v39  ;;  %v2664_v46 = vld [vmem:[#allocation3 + $0xb0] sm:$0xff]  }
  0xff   : > { %v2349_v48 = vpop.f32.mrf.mxu1 }
 0x100   : > { %v706_v53 = vpop.f32.mrf.mxu0 }
 0x101   : > { %v384_v50 = vpop.f32.mrf.mxu1 }
 0x102   : > { %v2380_v55 = vpop.f32.mrf.mxu0  ;;  %v385_v8 = vadd.f32 %v384_v50, %v338_v42 }
 0x103   : > { %v2350_v52 = vpop.f32.mrf.mxu1 }
 0x104   : > { %v828_v57 = vpop.f32.mrf.mxu0 }
 0x105   : > { %v438_v54 = vpop.f32.mrf.mxu1 }
 0x106   : > { %v2391_v59 = vpop.f32.mrf.mxu0  ;;  %v445_v4 = vadd.f32 %v438_v54, %v382_v1  ;;  %v2668_v54 = vld [vmem:[#allocation3 + $0xa8] sm:$0xff]  }
 0x107   : > { %v2355_v56 = vpop.f32.mrf.mxu1  ;;  %v2672_v59 = vld [vmem:[#allocation3 + $0x98] sm:$0xff]  }
 0x108   : > { %v831_v61 = vpop.f32.mrf.mxu0  ;;  %v2669_v56 = vld [vmem:[#allocation3 + $0xf0] sm:$0xff]  }
 0x109   : > { %v441_v58 = vpop.f32.mrf.mxu1 }
 0x10a   : > { %v2392_v63 = vpop.f32.mrf.mxu0  ;;  %v446_v11 = vadd.f32 %v441_v58, %v385_v8  ;;  %v2671_v58 = vld [vmem:[#allocation3 + $0xe8] sm:$0xff]   ;;  %v2678_v8 = vld [vmem:[#allocation3 + $0x80] sm:$0xff]  }
 0x10b   : > { %v2356_v60 = vpop.f32.mrf.mxu1  ;;  %v2676_v63 = vld [vmem:[#allocation3 + $0x88] sm:$0xff]  }
 0x10c   : > { %v2673_v60 = vld [vmem:[#allocation3 + $0xe0] sm:$0xff]  }
 0x10d   : > { %v511_v62 = vpop.f32.mrf.mxu1 }
 0x10e   : > { %v518_v9 = vadd.f32 %v511_v62, %v445_v4  ;;  %v2675_v62 = vld [vmem:[#allocation3 + $0xd8] sm:$0xff]  }
 0x10f   : > { %v2361_v2 = vpop.f32.mrf.mxu1 }
 0x110   : > { %v577_v13 = vadd.f32 %v570_v41, %v518_v9 }
 0x111   : > { %v514_v7 = vpop.f32.mrf.mxu1 }
 0x112   : > { %v519_v12 = vadd.f32 %v514_v7, %v446_v11  ;;  %v2677_v7 = vld [vmem:[#allocation3 + $0xd0] sm:$0xff]  }
 0x113   : > { %v2362_v10 = vpop.f32.mrf.mxu1 }
 0x114   : > { %v578_v15 = vadd.f32 %v573_v45, %v519_v12 }
 0x115   : > { %v644_v5 = vpop.f32.mrf.mxu1 }
 0x116   : > { %v651_v6 = vadd.f32 %v644_v5, %v577_v13 }
 0x117   : > { %v2373_v14 = vpop.f32.mrf.mxu1 }
 0x118   : > { %v710_v18 = vadd.f32 %v703_v49, %v651_v6  ;;  %v2680_v14 = vld [vmem:[#allocation3 + $0xc8] sm:$0xff]   ;;  %v2681_v6 = vld [vmem:[#allocation3 + $0x138] sm:$0xff]  }
 0x119   : > { %v647_v3 = vpop.f32.mrf.mxu1 }
 0x11a   : > { %v652_v17 = vadd.f32 %v647_v3, %v578_v15 }
 0x11b   : > { %v2374_v16 = vpop.f32.mrf.mxu1 }
 0x11c   : > { %v711_v24 = vadd.f32 %v706_v53, %v652_v17  ;;  %v2667_v53 = vld [vmem:[#allocation3 + $0xf8] sm:$0xff]  }
 0x11d   : > { %v776_v19 = vpop.f32.mrf.mxu1 }
 0x11e   : > { %v783_v20 = vadd.f32 %v776_v19, %v710_v18  ;;  %v2682_v19 = vld [vmem:[#allocation3 + $0xc0] sm:$0xff]  }
 0x11f   : > { %v2385_v22 = vpop.f32.mrf.mxu1 }
 0x120   : > { %v835_v23 = vadd.f32 %v828_v57, %v783_v20  ;;  %v2670_v57 = vld [vmem:[#allocation3 + $0xa0] sm:$0xff]   ;;  %v2683_v20 = vld [vmem:[#allocation3 + $0x130] sm:$0xff]  }
 0x121   : > { %v779_v25 = vpop.f32.mrf.mxu1 }
 0x122   : > { %v844_v26 = vadd.f32 %v2143_v21, %v835_v23  ;;  %v784_v27 = vadd.f32 %v779_v25, %v711_v24  ;;  %v2685_v23 = vld [vmem:[#allocation3 + $0x178] sm:$0xff]   ;;  %v2686_v24 = vld [vmem:[#allocation3 + $0x128] sm:$0xff]  }
 0x123   : > { %v2386_v28 = vpop.f32.mrf.mxu1 }
 0x124   : > { %v846_v29 = vmax.f32 %v844_v26, 0.0  ;;  %v836_v30 = vadd.f32 %v831_v61, %v784_v27  ;;  %v2674_v61 = vld [vmem:[#allocation3 + $0x90] sm:$0xff]   ;;  %v2688_v28 = vld [vmem:[#allocation3 + $0x120] sm:$0xff]  }
 0x125   : > { %v3128_v26 = vpop.f32.mrf.mxu1  ;;  %v2687_v27 = vld [vmem:[#allocation3 + $0x170] sm:$0xff]  }
 0x126   : > { %v2235_v31 = vpack.c.bf16 %v846_v29, %v846_v29  ;;  %v845_v32 = vadd.f32 %v2143_v21, %v836_v30 }
 0x127   : > { %v2397_v29 = vpop.f32.mrf.mxu1 }
 0x128   : > { %v860_v33 = vrot.slane %v2235_v31, 6  ;;  %v847_v34 = vmax.f32 %v845_v32, 0.0  ;;  %v2689_v31 = vld [vmem:[#allocation3 + $0x168] sm:$0xff]   ;;  %v2690_v32 = vld [vmem:[#allocation3 + $0x118] sm:$0xff]   ;;  %v2718_v29 = vld [vmem:[#allocation3 + $0x1c0] sm:$0xff]  }
 0x129   : > { %v3134_v30 = vpop.f32.mrf.mxu1 }
 0x12a   : > { %868 = vst [vmem:[#allocation2] sm:$0xc] %v860_v33  ;;  %v2236_v35 = vpack.c.bf16 %v847_v34, %v847_v34  ;;  %v861_v36 = vrot.slane %v860_v33, 4  ;;  %v2691_v34 = vld [vmem:[#allocation3 + $0x160] sm:$0xff]  }
 0x12b   : > { %v2398_v33 = vpop.f32.mrf.mxu1 }
 0x12c   : > { %v862_v37 = vrot.slane %v2236_v35, 6  ;;  %v2692_v35 = vld [vmem:[#allocation3 + $0x110] sm:$0xff]  }
 0x12e   : > { %v863_v38 = vsel %vm859_vm11, %v861_v36, %v862_v37  ;;  %v864_v39 = vrot.slane %v862_v37, 4  ;;  %v2693_v36 = vld [vmem:[#allocation3 + $0x158] sm:$0xff]   ;;  %v2694_v37 = vld [vmem:[#allocation3 + $0x108] sm:$0xff]  }
 0x12f   : > { %869 = vst [vmem:[#allocation2 + $0x4] sm:$0xf] %v863_v38 }
 0x130   : > { %870 = vst [vmem:[#allocation2 + $0x8] sm:$0x3] %v864_v39 }
 0x131   : > { %v1037_v41 = vld [vmem:[#allocation2] sm:$0xf] }
 0x132   : > { %v1169_v1 = vld [vmem:[#allocation2] sm:$0xe] }
 0x133   : > { %v1415_v38 = vld [vmem:[#allocation2] sm:$0xc] }
 0x136   : > { %v2661_v42 = vld [vmem:[#allocation2] sm:$0xff]  }
 0x137   : > { %v3089_v43 = vld [vmem:[#allocation2 + $0x4] sm:$0xf]  ;;  %v3092_v45 = vld [vmem:[#allocation2 + $0x8] ss:$0 sps:$4 sm:$0x11]   ;;  %2416 = vmatmul.mubr.bf16.vlgmr.msra.gmra.mxu0 %v2661_v42  ;;  %v2696_v42 = vld [vmem:[#allocation3 + $0x100] sm:$0xff]  }
 0x138   : > { %v2157_v44 = vcombine.low %v1037_v41, %v3089_v43  ;;  %2440 = vmatpush3.bf16.msra.mxu0 %v2662_v40  ;;  %v1073_v48 = vshll.u32 %v3092_v45, 16  ;;  %2455 = vmatprep.mubr.msk.bf16.mxu0 %vm2824_vm0, %v2823_v0  ;;  %v2167_v2 = vcombine.low %v1169_v1, %v3089_v43  ;;  %v3111_v4 = vld [vmem:[#allocation2 + $0x8] ss:$0 sps:$4 sm:$0x33]   ;;  %v1191_v10 = vrot.slane %v3092_v45, 1  ;;  %v2695_v41 = vld [vmem:[#allocation3 + $0x150] sm:$0xff]  }
 0x139   : > { %2441 = vmatprep.subr.bf16.mxu0 %v2823_v0  ;;  %v1315_v12 = vshrl.u32 %v3111_v4, 16  ;;  %v1318_v13 = vshll.u32 %v3111_v4, 16  ;;  %v2185_v39 = vcombine.low %v1415_v38, %v3089_v43  ;;  %v3143_v40 = vld [vmem:[#allocation2 + $0x8] ss:$0 sps:$4 sm:$0x77]   ;;  %v1437_v45 = vrot.slane %v3111_v4, 2 }
 0x13a   : > { %v1068_v47 = vshll.u32 %v2157_v44, 16  ;;  %v1066_v49 = vshrl.u32 %v2157_v44, 16  ;;  %v1075_v52 = vrot.slane %v1073_v48, 1  ;;  %v1190_v9 = vrot.slane %v2167_v2, 1  ;;  %v2705_v1 = vld [vmem:[#allocation3 + $0x1f0] sm:$0xff]   ;;  %v2707_v4 = vld [vmem:[#allocation3 + $0x1e8] sm:$0xff]  }
 0x13b   : > { %v1307_v11 = vshrl.u32 %v2167_v2, 16  ;;  %v1310_v5 = vshll.u32 %v2167_v2, 16  ;;  %v1317_v17 = vrot.slane %v1315_v12, 1  ;;  %v1320_v18 = vrot.slane %v1318_v13, 2  ;;  %v2706_v2 = vld [vmem:[#allocation3 + $0x1a0] sm:$0xff]   ;;  %v2724_v38 = vld [vmem:[#allocation3 + $0x210] sm:$0xff]  }
 0x13c   : > { %v1070_v50 = vrot.slane %v1068_v47, 1  ;;  %2442 = vmatpush3.bf16.msra.mxu0 %v2664_v46  ;;  %v1192_v3 = vsel %vm394_vm6, %v1190_v9, %v1191_v10  ;;  %v1436_v44 = vrot.slane %v2185_v39, 2  ;;  %v1553_v46 = vshrl.u32 %v2185_v39, 16  ;;  %v2710_v9 = vld [vmem:[#allocation3 + $0x190] sm:$0xff]   ;;  %v3168_v10 = vld [vmem:[#allocation2 + $0x8] sm:$0xf] }
 0x13d   : > { %2443 = vmatprep.subr.bf16.mxu0 %v2823_v0  ;;  %v1309_v15 = vrot.slane %v1307_v11, 1  ;;  %v1312_v16 = vrot.slane %v1310_v5, 2  ;;  %v1321_v22 = vor.u32 %v1320_v18, %v1317_v17  ;;  %v1556_v47 = vshll.u32 %v2185_v39, 16  ;;  %v2711_v11 = vld [vmem:[#allocation3 + $0x1d8] sm:$0xff]   ;;  %v2712_v5 = vld [vmem:[#allocation3 + $0x188] sm:$0xff]  }
 0x13e   : > { %v1071_v51 = vor.u32 %v1070_v50, %v1066_v49  ;;  %v1561_v48 = vshrl.u32 %v3143_v40, 16  ;;  %v1564_v49 = vshll.u32 %v3143_v40, 16  ;;  %v2698_v50 = vld [vmem:[#allocation3 + $0x148] sm:$0xff]   ;;  %v1661_v12 = vld [vmem:[#allocation2] sm:$0x8] }
 0x13f   : > { %v1313_v21 = vor.u32 %v1312_v16, %v1309_v15  ;;  %v2203_v13 = vcombine.low %v1661_v12, %v3089_v43  ;;  %v1683_v16 = vrot.slane %v3143_v40, 3  ;;  %v2725_v39 = vld [vmem:[#allocation3 + $0x208] sm:$0xff]   ;;  %v2726_v40 = vld [vmem:[#allocation3 + $0x200] sm:$0xff]  }
 0x140   : > { %v1076_v55 = vsel %vm280_vm2, %v1071_v51, %v1075_v52  ;;  %2444 = vmatpush3.bf16.msra.mxu0 %v2668_v54  ;;  %v2699_v51 = vld [vmem:[#allocation3 + $0x1b8] sm:$0xff]   ;;  %v1438_v52 = vsel %vm526_vm4, %v1436_v44, %v1437_v45  ;;  %v1558_v54 = vrot.slane %v1556_v47, 3 }
 0x141   : > { %2436 = vmatmul.mubr.bf16.vlgmr.msra.gmra.mxu1 %v1076_v55  ;;  %2445 = vmatprep.subr.bf16.mxu0 %v2823_v0  ;;  %v1322_v25 = vsel %vm453_vm7, %v1313_v21, %v1321_v22  ;;  %v1563_v55 = vrot.slane %v1561_v48, 2  ;;  %v1682_v15 = vrot.slane %v2203_v13, 3  ;;  %v1799_v17 = vshrl.u32 %v2203_v13, 16  ;;  %v2716_v21 = vld [vmem:[#allocation3 + $0x1c8] sm:$0xff]   ;;  %v2717_v22 = vld [vmem:[#allocation3 + $0x238] sm:$0xff]  }
 0x142   : > { %2460 = vmatpush3.bf16.msra.mxu1 %v2667_v53  ;;  %2475 = vmatprep.mubr.msk.bf16.mxu1 %vm2824_vm0, %v2823_v0  ;;  %v1555_v53 = vrot.slane %v1553_v46, 2  ;;  %v1802_v18 = vshll.u32 %v2203_v13, 16 }
 0x143   : > { %2461 = vmatprep.subr.bf16.mxu1 %v2823_v0 }
 0x144   : > { %2446 = vmatpush3.bf16.msra.mxu0 %v2670_v57  ;;  %v2700_v57 = vld [vmem:[#allocation3 + $0x140] sm:$0xff]  }
 0x145   : > { %2447 = vmatprep.subr.bf16.mxu0 %v2823_v0 }
 0x146   : > { %2462 = vmatpush3.bf16.msra.mxu1 %v2669_v56  ;;  %v1566_v56 = vrot.slane %v1564_v49, 3 }
 0x147   : > { %2463 = vmatprep.subr.bf16.mxu1 %v2823_v0 }
 0x148   : > { %2448 = vmatpush3.bf16.msra.mxu0 %v2672_v59  ;;  %v1559_v59 = vor.u32 %v1558_v54, %v1555_v53 }
 0x149   : > { %2449 = vmatprep.subr.bf16.mxu0 %v2823_v0 }
 0x14a   : > { %2464 = vmatpush3.bf16.msra.mxu1 %v2671_v58  ;;  %v2701_v58 = vld [vmem:[#allocation3 + $0x1b0] sm:$0xff]  }
 0x14b   : > { %2465 = vmatprep.subr.bf16.mxu1 %v2823_v0 }
 0x14c   : > { %2450 = vmatpush3.bf16.msra.mxu0 %v2674_v61  ;;  %v2703_v61 = vld [vmem:[#allocation3 + $0x1f8] sm:$0xff]  }
 0x14d   : > { %2451 = vmatprep.subr.bf16.mxu0 %v2823_v0 }
 0x14e   : > { %2466 = vmatpush3.bf16.msra.mxu1 %v2673_v60  ;;  %v1567_v60 = vor.u32 %v1566_v56, %v1563_v55 }
 0x14f   : > { %2467 = vmatprep.subr.bf16.mxu1 %v2823_v0 }
 0x150   : > { %2452 = vmatpush3.bf16.msra.mxu0 %v2676_v63  ;;  %v1568_v63 = vsel %vm586_vm8, %v1559_v59, %v1567_v60 }
 0x151   : > { %2453 = vmatprep.subr.bf16.mxu0 %v2823_v0 }
 0x152   : > { %2468 = vmatpush3.bf16.msra.mxu1 %v2675_v62  ;;  %v2704_v62 = vld [vmem:[#allocation3 + $0x1a8] sm:$0xff]  }
 0x153   : > { %2469 = vmatprep.subr.bf16.mxu1 %v2823_v0 }
 0x154   : > { %2454 = vmatpush3.bf16.msra.mxu0 %v2678_v8  ;;  %v2709_v8 = vld [vmem:[#allocation3 + $0x1e0] sm:$0xff]  }
 0x155   : > { %2479 = vmatprep.subr.bf16.mxu0 %v2823_v0 }
 0x156   : > { %2470 = vmatpush3.bf16.msra.mxu1 %v2677_v7  ;;  %v2708_v7 = vld [vmem:[#allocation3 + $0x198] sm:$0xff]  }
 0x157   : > { %2471 = vmatprep.subr.bf16.mxu1 %v2823_v0  ;;  %2456 = vmatmul.mubr.bf16.vlgmr.msra.gmra.mxu0 %v1192_v3  ;;  %v2714_v3 = vld [vmem:[#allocation3 + $0x180] sm:$0xff]  }
 0x158   : > { %2480 = vmatpush3.bf16.msra.mxu0 %v2681_v6  ;;  %2495 = vmatprep.mubr.msk.bf16.mxu0 %vm2824_vm0, %v2823_v0  ;;  %v2713_v6 = vld [vmem:[#allocation3 + $0x1d0] sm:$0xff]  }
 0x159   : > { %2481 = vmatprep.subr.bf16.mxu0 %v2823_v0 }
 0x15a   : > { %2472 = vmatpush3.bf16.msra.mxu1 %v2680_v14  ;;  %v2212_v14 = vcombine.low %v3168_v10, %v3168_v10 }
 0x15b   : > { %2473 = vmatprep.subr.bf16.mxu1 %v2823_v0 }
 0x15c   : > { %2482 = vmatpush3.bf16.msra.mxu0 %v2683_v20  ;;  %v1810_v20 = vshll.u32 %v2212_v14, 16 }
 0x15d   : > { %2483 = vmatprep.subr.bf16.mxu0 %v2823_v0 }
 0x15e   : > { %2474 = vmatpush3.bf16.msra.mxu1 %v2682_v19  ;;  %v1807_v19 = vshrl.u32 %v2212_v14, 16 }
 0x15f   : > { %2499 = vmatprep.subr.bf16.mxu1 %v2823_v0 }
 0x160   : > { %2484 = vmatpush3.bf16.msra.mxu0 %v2686_v24  ;;  %v1801_v24 = vrot.slane %v1799_v17, 3 }
 0x161   : > { %2476 = vmatmul.mubr.bf16.vlgmr.msra.gmra.mxu1 %v1322_v25  ;;  %2485 = vmatprep.subr.bf16.mxu0 %v2823_v0  ;;  %v1804_v25 = vrot.slane %v1802_v18, 4 }
 0x162   : > { %2500 = vmatpush3.bf16.msra.mxu1 %v2685_v23  ;;  %2515 = vmatprep.mubr.msk.bf16.mxu1 %vm2824_vm0, %v2823_v0  ;;  %v1684_v23 = vsel %vm659_vm5, %v1682_v15, %v1683_v16 }
 0x163   : > { %2501 = vmatprep.subr.bf16.mxu1 %v2823_v0 }
 0x164   : > { %2486 = vmatpush3.bf16.msra.mxu0 %v2688_v28  ;;  %v1812_v28 = vrot.slane %v1810_v20, 4 }
 0x165   : > { %2487 = vmatprep.subr.bf16.mxu0 %v2823_v0 }
 0x166   : > { %2502 = vmatpush3.bf16.msra.mxu1 %v2687_v27  ;;  %v1809_v27 = vrot.slane %v1807_v19, 3 }
 0x167   : > { %2503 = vmatprep.subr.bf16.mxu1 %v2823_v0 }
 0x168   : > { %2488 = vmatpush3.bf16.msra.mxu0 %v2690_v32  ;;  %v1805_v32 = vor.u32 %v1804_v25, %v1801_v24  ;;  %v1813_v33 = vor.u32 %v1812_v28, %v1809_v27 }
 0x169   : > { %2489 = vmatprep.subr.bf16.mxu0 %v2823_v0 }
 0x16a   : > { %2504 = vmatpush3.bf16.msra.mxu1 %v2689_v31  ;;  %v2719_v31 = vld [vmem:[#allocation3 + $0x230] sm:$0xff]  }
 0x16b   : > { %2505 = vmatprep.subr.bf16.mxu1 %v2823_v0 }
 0x16c   : > { %2490 = vmatpush3.bf16.msra.mxu0 %v2692_v35  ;;  %v1814_v35 = vsel %vm718_vm9, %v1805_v32, %v1813_v33 }
 0x16d   : > { %2491 = vmatprep.subr.bf16.mxu0 %v2823_v0 }
 0x16e   : > { %2506 = vmatpush3.bf16.msra.mxu1 %v2691_v34  ;;  %v2721_v34 = vld [vmem:[#allocation3 + $0x228] sm:$0xff]  }
 0x16f   : > { %2507 = vmatprep.subr.bf16.mxu1 %v2823_v0 }
 0x170   : > { %2492 = vmatpush3.bf16.msra.mxu0 %v2694_v37  ;;  %v2723_v37 = vld [vmem:[#allocation3 + $0x218] sm:$0xff]  }
 0x171   : > { %2493 = vmatprep.subr.bf16.mxu0 %v2823_v0 }
 0x172   : > { %2508 = vmatpush3.bf16.msra.mxu1 %v2693_v36  ;;  %v2722_v36 = vld [vmem:[#allocation3 + $0x220] sm:$0xff]  }
 0x173   : > { %2509 = vmatprep.subr.bf16.mxu1 %v2823_v0 }
 0x174   : > { %2494 = vmatpush3.bf16.msra.mxu0 %v2696_v42  ;;  %v2146_v42 = vld [vmem:[%s3252_s4] ss:$0 sm:$0xff] }
 0x175   : > { %2519 = vmatprep.subr.bf16.mxu0 %v2823_v0  ;;  %v916_v44 = vadd.f32 %v2146_v42, %v3128_v26  ;;  %v919_v48 = vadd.f32 %v2146_v42, %v3134_v30 }
 0x176   : > { %2510 = vmatpush3.bf16.msra.mxu1 %v2695_v41  ;;  %v2221_v41 = vcombine.low %v3089_v43, %v3168_v10 }
 0x177   : > { %2511 = vmatprep.subr.bf16.mxu1 %v2823_v0  ;;  %2496 = vmatmul.mubr.bf16.vlgmr.msra.gmra.mxu0 %v1438_v52 }
 0x178   : > { %2520 = vmatpush3.bf16.msra.mxu0 %v2699_v51  ;;  %2535 = vmatprep.mubr.msk.bf16.mxu0 %vm2824_vm0, %v2823_v0 }
 0x179   : > { %2521 = vmatprep.subr.bf16.mxu0 %v2823_v0 }
 0x17a   : > { %2512 = vmatpush3.bf16.msra.mxu1 %v2698_v50 }
 0x17b   : > { %2513 = vmatprep.subr.bf16.mxu1 %v2823_v0 }
 0x17c   : > { %2522 = vmatpush3.bf16.msra.mxu0 %v2701_v58 }
 0x17d   : > { %2523 = vmatprep.subr.bf16.mxu0 %v2823_v0 }
 0x17e   : > { %2514 = vmatpush3.bf16.msra.mxu1 %v2700_v57 }
 0x17f   : > { %2539 = vmatprep.subr.bf16.mxu1 %v2823_v0 }
 0x180   : > { %2524 = vmatpush3.bf16.msra.mxu0 %v2704_v62 }
 0x181   : > { %2516 = vmatmul.mubr.bf16.vlgmr.msra.gmra.mxu1 %v1568_v63  ;;  %2525 = vmatprep.subr.bf16.mxu0 %v2823_v0 }
 0x182   : > { %2540 = vmatpush3.bf16.msra.mxu1 %v2703_v61  ;;  %2555 = vmatprep.mubr.msk.bf16.mxu1 %vm2824_vm0, %v2823_v0 }
 0x183   : > { %2541 = vmatprep.subr.bf16.mxu1 %v2823_v0 }
 0x184   : > { %2526 = vmatpush3.bf16.msra.mxu0 %v2706_v2 }
 0x185   : > { %2527 = vmatprep.subr.bf16.mxu0 %v2823_v0 }
 0x186   : > { %2542 = vmatpush3.bf16.msra.mxu1 %v2705_v1 }
 0x187   : > { %2543 = vmatprep.subr.bf16.mxu1 %v2823_v0 }
 0x188   : > { %2528 = vmatpush3.bf16.msra.mxu0 %v2708_v7 }
 0x189   : > { %2529 = vmatprep.subr.bf16.mxu0 %v2823_v0 }
 0x18a   : > { %2544 = vmatpush3.bf16.msra.mxu1 %v2707_v4 }
 0x18b   : > { %2545 = vmatprep.subr.bf16.mxu1 %v2823_v0 }
 0x18c   : > { %2530 = vmatpush3.bf16.msra.mxu0 %v2710_v9 }
 0x18d   : > { %2531 = vmatprep.subr.bf16.mxu0 %v2823_v0 }
 0x18e   : > { %2546 = vmatpush3.bf16.msra.mxu1 %v2709_v8 }
 0x18f   : > { %2547 = vmatprep.subr.bf16.mxu1 %v2823_v0 }
 0x190   : > { %2532 = vmatpush3.bf16.msra.mxu0 %v2712_v5 }
 0x191   : > { %2533 = vmatprep.subr.bf16.mxu0 %v2823_v0 }
 0x192   : > { %2548 = vmatpush3.bf16.msra.mxu1 %v2711_v11 }
 0x193   : > { %2549 = vmatprep.subr.bf16.mxu1 %v2823_v0 }
 0x194   : > { %2534 = vmatpush3.bf16.msra.mxu0 %v2714_v3 }
 0x195   : > { %2559 = vmatprep.subr.bf16.mxu0 %v2823_v0 }
 0x196   : > { %2550 = vmatpush3.bf16.msra.mxu1 %v2713_v6 }
 0x197   : > { %2551 = vmatprep.subr.bf16.mxu1 %v2823_v0  ;;  %2536 = vmatmul.mubr.bf16.vlgmr.msra.gmra.mxu0 %v1684_v23 }
 0x198   : > { %2560 = vmatpush3.bf16.msra.mxu0 %v2717_v22  ;;  %2575 = vmatprep.mubr.msk.bf16.mxu0 %vm2824_vm0, %v2823_v0 }
 0x199   : > { %2561 = vmatprep.subr.bf16.mxu0 %v2823_v0 }
 0x19a   : > { %2552 = vmatpush3.bf16.msra.mxu1 %v2716_v21 }
 0x19b   : > { %2553 = vmatprep.subr.bf16.mxu1 %v2823_v0 }
 0x19c   : > { %2562 = vmatpush3.bf16.msra.mxu0 %v2719_v31 }
 0x19d   : > { %2563 = vmatprep.subr.bf16.mxu0 %v2823_v0 }
 0x19e   : > { %2554 = vmatpush3.bf16.msra.mxu1 %v2718_v29 }
 0x1a0   : > { %2564 = vmatpush3.bf16.msra.mxu0 %v2721_v34 }
 0x1a1   : > { %2556 = vmatmul.mubr.bf16.vlgmr.msra.gmra.mxu1 %v1814_v35  ;;  %2565 = vmatprep.subr.bf16.mxu0 %v2823_v0 }
 0x1a4   : > { %2566 = vmatpush3.bf16.msra.mxu0 %v2722_v36 }
 0x1a5   : > { %2567 = vmatprep.subr.bf16.mxu0 %v2823_v0 }
 0x1a8   : > { %2568 = vmatpush3.bf16.msra.mxu0 %v2723_v37 }
 0x1a9   : > { %2569 = vmatprep.subr.bf16.mxu0 %v2823_v0 }
 0x1ac   : > { %2570 = vmatpush3.bf16.msra.mxu0 %v2724_v38 }
 0x1ad   : > { %2571 = vmatprep.subr.bf16.mxu0 %v2823_v0 }
 0x1b0   : > { %2572 = vmatpush3.bf16.msra.mxu0 %v2725_v39 }
 0x1b1   : > { %2573 = vmatprep.subr.bf16.mxu0 %v2823_v0 }
 0x1b4   : > { %2574 = vmatpush3.bf16.msra.mxu0 %v2726_v40 }
 0x1b7   : > { %2576 = vmatmul.mubr.bf16.vlgmr.msra.gmra.mxu0 %v2221_v41 }
 0x1f7   : > { %v1028_v45 = vpop.f32.mrf.mxu0 }
 0x1f8   : > { %v1035_v46 = vadd.f32 %v1028_v45, %v916_v44 }
 0x1f9   : > { %v2417_v47 = vpop.f32.mrf.mxu0 }
 0x1fb   : > { %v1031_v49 = vpop.f32.mrf.mxu0 }
 0x1fc   : > { %v1036_v50 = vadd.f32 %v1031_v49, %v919_v48 }
 0x1fd   : > { %v2418_v51 = vpop.f32.mrf.mxu0 }
 0x201   : > { %v1160_v0 = vpop.f32.mrf.mxu1 }
 0x202   : > { %v1167_v52 = vadd.f32 %v1160_v0, %v1035_v46 }
 0x203   : > { %v2437_v53 = vpop.f32.mrf.mxu1 }
 0x205   : > { %v1163_v54 = vpop.f32.mrf.mxu1 }
 0x206   : > { %v1168_v43 = vadd.f32 %v1163_v54, %v1036_v50 }
 0x207   : > { %v2438_v55 = vpop.f32.mrf.mxu1 }
 0x217   : > { %v1276_v56 = vpop.f32.mrf.mxu0 }
 0x218   : > { %v1283_v57 = vadd.f32 %v1276_v56, %v1167_v52 }
 0x219   : > { %v2457_v58 = vpop.f32.mrf.mxu0 }
 0x21b   : > { %v1279_v59 = vpop.f32.mrf.mxu0 }
 0x21c   : > { %v1284_v60 = vadd.f32 %v1279_v59, %v1168_v43 }
 0x21d   : > { %v2458_v26 = vpop.f32.mrf.mxu0 }
 0x221   : > { %v1406_v61 = vpop.f32.mrf.mxu1 }
 0x222   : > { %v1413_v62 = vadd.f32 %v1406_v61, %v1283_v57 }
 0x223   : > { %v2477_v63 = vpop.f32.mrf.mxu1 }
 0x225   : > { %v1409_v1 = vpop.f32.mrf.mxu1 }
 0x226   : > { %v1414_v30 = vadd.f32 %v1409_v1, %v1284_v60 }
 0x227   : > { %v2478_v2 = vpop.f32.mrf.mxu1 }
 0x237   : > { %v1522_v4 = vpop.f32.mrf.mxu0 }
 0x238   : > { %v1529_v19 = vadd.f32 %v1522_v4, %v1413_v62 }
 0x239   : > { %v2497_v7 = vpop.f32.mrf.mxu0 }
 0x23b   : > { %v1525_v8 = vpop.f32.mrf.mxu0 }
 0x23c   : > { %v1530_v21 = vadd.f32 %v1525_v8, %v1414_v30 }
 0x23d   : > { %v2498_v9 = vpop.f32.mrf.mxu0 }
 0x241   : > { %v1652_v10 = vpop.f32.mrf.mxu1 }
 0x242   : > { %v1659_v20 = vadd.f32 %v1652_v10, %v1529_v19 }
 0x243   : > { %v2517_v11 = vpop.f32.mrf.mxu1 }
 0x245   : > { %v1655_v5 = vpop.f32.mrf.mxu1 }
 0x246   : > { %v1660_v23 = vadd.f32 %v1655_v5, %v1530_v21 }
 0x247   : > { %v2518_v12 = vpop.f32.mrf.mxu1 }
 0x257   : > { %v1768_v13 = vpop.f32.mrf.mxu0 }
 0x258   : > { %v1775_v22 = vadd.f32 %v1768_v13, %v1659_v20 }
 0x259   : > { %v2537_v14 = vpop.f32.mrf.mxu0 }
 0x25b   : > { %v1771_v6 = vpop.f32.mrf.mxu0 }
 0x25c   : > { %v1776_v27 = vadd.f32 %v1771_v6, %v1660_v23 }
 0x25d   : > { %v2538_v3 = vpop.f32.mrf.mxu0 }
 0x261   : > { %v1898_v15 = vpop.f32.mrf.mxu1 }
 0x262   : > { %v1905_v24 = vadd.f32 %v1898_v15, %v1775_v22 }
 0x263   : > { %v2557_v16 = vpop.f32.mrf.mxu1 }
 0x265   : > { %v1901_v17 = vpop.f32.mrf.mxu1 }
 0x266   : > { %v1906_v31 = vadd.f32 %v1901_v17, %v1776_v27 }
 0x267   : > { %v2558_v18 = vpop.f32.mrf.mxu1 }
 0x277   : > { %v2008_v25 = vpop.f32.mrf.mxu0 }
 0x278   : > { %v2015_v28 = vadd.f32 %v2008_v25, %v1905_v24 }
 0x279   : > { %v2577_v29 = vpop.f32.mrf.mxu0 }
 0x27a   : > { %v2017_v32 = vmax.f32 %v2015_v28, 0.0 }
 0x27b   : > { %v2011_v33 = vpop.f32.mrf.mxu0 }
 0x27c   : > { %2019 = vst [vmem:[%s259_s18] sm:$0xff] %v2017_v32  ;;  %v2016_v34 = vadd.f32 %v2011_v33, %v1906_v31 }
 0x27d   : > { %v2578_v35 = vpop.f32.mrf.mxu0 }
 0x27e   : > { %v2018_v36 = vmax.f32 %v2016_v34, 0.0 }
 0x280   : > { %2020 = vst [vmem:[%s259_s18 + $0x8] sm:$0xff] %v2018_v36 }
 0x281   : > { %2767 = shalt.err (!%p2764_p0)
}
 0x282   : > { %s2768_s13 = scalar_lea.hbm %s3206_s9, 256  ;;  %s2772_s16 = scalar_lea.hbm %s3254_s6, 512 }
 0x283   : > { %p2769_p1 = scmp.ne.s32.totalorder %s3206_s9, %s2768_s13  ;;  %p2773_p4 = scmp.lt.s32.totalorder %s3206_s9, %s3254_s6 }
 0x284   : > { %p2774_p7 = scmp.lt.s32.totalorder %s2772_s16, %s2768_s13 }
 0x285   : > { %p2770_p2 = pnand %p2769_p1, %p2902_p5 }
 0x286   : > { %p2775_p8 = por %p2774_p7, %p2773_p4 }
 0x287   : > { %p2771_p3 = pneg %p2770_p2 }
 0x289   : > { %p2776_p6 = pnand %p2775_p8, %p2771_p3 }
 0x28b   : > { %2779 = shalt.err (!%p2776_p6)
}
 0x28c   : > { %s2827_s20 = smov 128   ;;  %s2828_s28 = smov 8  }
 0x28d   : > { %2584 = dma.vmem_to_hbm [thread:$0]  (%p2902_p5), %s3201_s19, 256, %s3206_s9, %s3208_s10, %s2827_s20, %s2827_s20, %s2828_s28  }
 0x28e PF: > { %p2596_p9 = scmp.ge.s32.totalorder %s2818_s24, 2  ;;  %s2050_s29 = sand.u32 1, %s2806_s21  }
 0x28f   : > { %p3258_p10 = scmp.ne.s32.totalorder %s3256_s8, 0  ;;  %s2051_s26 = scalar_lea.sflag [#allocation5], %s2050_s29 }
 0x291   : > { %p2591_p11 = pnand %p2596_p9, %p3258_p10 }
 0x293   : > { %p2592_p12 = pneg %p2591_p11 }
 0x295   : > { %2801 = dma.done.wait (%p2592_p12), %s2051_s26, 256  }
 0x296   : > { %2803 = vsyncadd (%p2592_p12), %s2051_s26, 4294967040  ;;  %p17_p13 = scmp.ge.s32.totalorder %s2889_s27, 4   ;;  %s3259_s21 = smov %s2810_s22 }
 0x297   : > { %s3260_s22 = smov %s2814_s23  ;;  %s3261_s23 = smov %s2900_s30 }
 0x298   : > { %s3262_s24 = smov %s2889_s27  ;;  %19 = sbr.rel (!%p17_p13) target bundleno = 4 (0x4), region = 100 }
 0x29d   :  { %2056 = vsyncpa [#allocation4], 1 }
 0x29e   :  { %2058 = vsyncpa [#allocation4 + $0x1], 1 }
 0x29f   :  { %2059 = vsyncpa [#allocation5], 1 }
 0x2a0   :  { %2061 = vsyncpa [#allocation5 + $0x1], 1 }

</bundles_post_ra>
